<compile_context>
chip_gen: v7x
topology: tpu7x:2x2x1
jax: 0.10.0
libtpu: 0.0.40
codegen_flags: <defaults>
</compile_context>

<pallas_src>
import functools

import jax
import jax.numpy as jnp
import numpy as np
from jax.experimental import pallas as pl
from jax.experimental.pallas import tpu as pltpu

LN_EPS = 1e-5       # torch.nn.LayerNorm default
NEG_INF = -1e30


def _ceil_to(a, m):
    return -(-a // m) * m


def _layer_norm(v, gamma, beta):
    mu = jnp.mean(v, axis=-1, keepdims=True)
    var = jnp.mean((v - mu) ** 2, axis=-1, keepdims=True)
    return (v - mu) * jax.lax.rsqrt(var + LN_EPS) * gamma + beta


def _erf(x):
    # Abramowitz & Stegun 7.1.26 (|err| <= 1.5e-7): reproduces torch's exact erf-GELU
    # within fp32 without relying on an erf lowering in Mosaic.
    a1, a2, a3, a4, a5 = 0.254829592, -0.284496736, 1.421413741, -1.453152027, 1.061405429
    p = 0.3275911
    ax = jnp.abs(x)
    t = 1.0 / (1.0 + p * ax)
    poly = ((((a5 * t + a4) * t + a3) * t + a2) * t + a1) * t
    e = 1.0 - poly * jnp.exp(-ax * ax)
    return jnp.where(x >= 0, e, -e)


def _gelu_exact(x):
    return 0.5 * x * (1.0 + _erf(x * 0.7071067811865476))


# ---------------------------------------------------------------------------
# Wrapper-side parameter packing: three dense bf16 weight arrays + one f32 row slab.
# ---------------------------------------------------------------------------
_VECTOR_ORDER = ("gq", "bgq", "bq", "gkv", "bgkv", "bkv", "bm", "gf", "bgf", "bf1", "bf2sc")


def pack_params(params, *, H, d_head, d_in, d_ctx, d_expand, d_out):
    (gq, bgq, wq, bq, gkv, bgkv, wkv, bkv, wm, bm,
     gf, bgf, wf1, bf1, wf2, bf2, wsc, bsc) = params
    bf16 = jnp.bfloat16

    # --- attention weights, bf16, densely packed --------------------------------
    w_kv = wkv.astype(bf16)                                    # (d_ctx, H*(d_head+d_in))

    r_wm = _ceil_to(d_in, 16)                                  # bf16 sublane alignment
    qm_w = max(H * d_head, d_in)
    w_qm = jnp.zeros((r_wm + H * d_in, qm_w), bf16)
    w_qm = w_qm.at[:d_in, :H * d_head].set(wq.astype(bf16))            # q_proj weight
    w_qm = w_qm.at[r_wm:r_wm + H * d_in, :d_in].set(wm.astype(bf16))   # merge_head_proj

    # --- FF + shortcut weights (manually DMA'd, overlapped with attention) ------
    # shortcut is a Linear here (d_in != d_out); it is row-stacked under wf2 so the
    # final matmul computes ff + shortcut in one pass.
    r_f2 = _ceil_to(d_in, 16)
    ff_w = max(d_expand, d_out)
    w2sc = jnp.concatenate([wf2, wsc], axis=0)                 # (d_expand + d_in, d_out)
    w_ff = jnp.zeros((r_f2 + d_expand + d_in, ff_w), bf16)
    w_ff = w_ff.at[:d_in, :d_expand].set(wf1.astype(bf16))
    w_ff = w_ff.at[r_f2:r_f2 + d_expand + d_in, :d_out].set(w2sc.astype(bf16))

    # --- per-row bias / gamma / beta slab, kept f32 ------------------------------
    vectors = {"gq": gq, "bgq": bgq, "bq": bq, "gkv": gkv, "bgkv": bgkv, "bkv": bkv,
               "bm": bm, "gf": gf, "bgf": bgf, "bf1": bf1, "bf2sc": bf2 + bsc}
    vw = max(int(v.reshape(-1).shape[0]) for v in vectors.values())
    rows, v_meta = [], {}
    for i, name in enumerate(_VECTOR_ORDER):
        vec = vectors[name].astype(jnp.float32).reshape(-1)
        L = int(vec.shape[0])
        rows.append(jnp.zeros((1, vw), jnp.float32).at[0, :L].set(vec))
        v_meta[name] = (i, L)
    v_slab = jnp.concatenate(rows, axis=0)

    return dict(w_kv=w_kv, w_qm=w_qm, w_ff=w_ff, v_slab=v_slab,
                v_meta=v_meta, r_wm=r_wm, r_f2=r_f2)


# ---------------------------------------------------------------------------
# Kernel
# ---------------------------------------------------------------------------
def _cross_attn_kernel(x_ref, ctx_ref, bias_ref, wkv_ref, wqm_ref, vrow_ref, wff_hbm,
                       o_ref, wff_vmem, dma_sem, *,
                       H, d_head, d_in, d_expand, d_out, scale, v_meta, r_wm, r_f2):
    f32, bf16 = jnp.float32, jnp.bfloat16

    # Kick off the FF/shortcut weight fetch so its DMA hides behind the attention phase.
    ff_copy = pltpu.make_async_copy(wff_hbm, wff_vmem, dma_sem)
    ff_copy.start()

    def vrow(name):                                            # (1, L) f32 row
        i, L = v_meta[name]
        return vrow_ref[i:i + 1, 0:L]

    x = x_ref[...].astype(f32)                                 # (B*N, d_in)
    ctx = ctx_ref[...].astype(f32)                             # (B*M, d_ctx)
    attn_bias = bias_ref[...]                                  # (B*N, B*M) block-diag, f32

    # q projection: LayerNorm (f32) -> Linear (bf16 operands, f32 accumulate)
    q = jnp.dot(_layer_norm(x, vrow("gq"), vrow("bgq")).astype(bf16),
                wqm_ref[0:d_in, 0:H * d_head],
                preferred_element_type=f32) + vrow("bq")       # (BN, H*d_head)

    # fused kv projection: one 160-wide matmul, then static lane slices
    ctx_n = _layer_norm(ctx, vrow("gkv"), vrow("bgkv")).astype(bf16)
    kv = jnp.dot(ctx_n, wkv_ref[...], preferred_element_type=f32) + vrow("bkv")
    k = kv[:, 0:H * d_head]                                    # (BM, H*d_head)
    v = kv[:, H * d_head:H * (d_head + d_in)]                  # (BM, H*d_in)

    q_b, k_b, v_b = q.astype(bf16), k.astype(bf16), v.astype(bf16)

    heads = []
    for h in range(H):                                         # H static -> unrolled on MXU
        q_h = q_b[:, h * d_head:(h + 1) * d_head]
        k_h = k_b[:, h * d_head:(h + 1) * d_head]
        v_h = v_b[:, h * d_in:(h + 1) * d_in]
        s = jax.lax.dot_general(q_h, k_h, (((1,), (1,)), ((), ())),
                                preferred_element_type=f32) * scale + attn_bias
        s = s - jnp.max(s, axis=-1, keepdims=True)
        p = jnp.exp(s)
        p = p * pl.reciprocal(jnp.sum(p, axis=-1, keepdims=True), approx=True)
        # TODO(synk): attention dropout is identity here (eval-mode / deterministic kernel).
        heads.append(jnp.dot(p.astype(bf16), v_h, preferred_element_type=f32))

    # One lane-dense (BN, H*d_in) tile -> a single K=H*d_in merge_head_proj matmul.
    o_cat = jnp.concatenate(heads, axis=-1).astype(bf16)
    merged = jnp.dot(o_cat, wqm_ref[r_wm:r_wm + H * d_in, 0:d_in],
                     preferred_element_type=f32)
    x2 = x + merged + vrow("bm")

    # FF + shortcut weights must be resident now.
    ff_copy.wait()
    hdn = jnp.dot(_layer_norm(x2, vrow("gf"), vrow("bgf")).astype(bf16),
                  wff_vmem[0:d_in, 0:d_expand],
                  preferred_element_type=f32) + vrow("bf1")
    g = _gelu_exact(hdn)                                       # exact GELU, f32
    # TODO(synk): FF dropout is identity here (eval-mode / deterministic kernel).
    # shortcut folded into the second FF matmul: [gelu(hdn), x2] @ [wf2; wsc] + (bf2+bsc)
    cat = jnp.concatenate([g, x2], axis=-1).astype(bf16)       # (BN, d_expand + d_in)
    out = jnp.dot(cat, wff_vmem[r_f2:r_f2 + d_expand + d_in, 0:d_out],
                  preferred_element_type=f32) + vrow("bf2sc")
    o_ref[...] = out.astype(o_ref.dtype)


# ---------------------------------------------------------------------------
# Wrapper
# ---------------------------------------------------------------------------
def cross_attention_block(x, context, packed, *, H, d_head, d_in, d_ctx, d_expand, d_out):
    B, N, _ = x.shape
    _, M, _ = context.shape
    x2d = x.reshape(B * N, d_in)
    ctx2d = context.reshape(B * M, d_ctx)
    scale = float(d_head) ** -0.5

    # Block-diagonal additive bias (trace-time numpy constant) keeps attention inside
    # each batch element while every matmul/LN runs over all B*N (or B*M) rows at once.
    rb = np.repeat(np.arange(B), N)
    cb = np.repeat(np.arange(B), M)
    attn_bias = jnp.asarray(
        np.where(rb[:, None] == cb[None, :], 0.0, NEG_INF).astype(np.float32))

    w_kv, w_qm, w_ff = packed["w_kv"], packed["w_qm"], packed["w_ff"]
    v_slab = packed["v_slab"]

    kernel = functools.partial(
        _cross_attn_kernel, H=H, d_head=d_head, d_in=d_in, d_expand=d_expand,
        d_out=d_out, scale=scale, v_meta=packed["v_meta"],
        r_wm=packed["r_wm"], r_f2=packed["r_f2"])

    out2d = pl.pallas_call(
        kernel,
        out_shape=jax.ShapeDtypeStruct((B * N, d_out), x.dtype),
        grid=(1,),   # whole problem (<1 MiB) fits VMEM on v5e / v6e / v7x
        in_specs=[pl.BlockSpec(x2d.shape, lambda i: (0, 0)),
                  pl.BlockSpec(ctx2d.shape, lambda i: (0, 0)),
                  pl.BlockSpec(attn_bias.shape, lambda i: (0, 0)),
                  pl.BlockSpec(w_kv.shape, lambda i: (0, 0)),
                  pl.BlockSpec(w_qm.shape, lambda i: (0, 0)),
                  pl.BlockSpec(v_slab.shape, lambda i: (0, 0)),
                  pl.BlockSpec(memory_space=pl.ANY)],          # FF weights: manual DMA
        out_specs=pl.BlockSpec((B * N, d_out), lambda i: (0, 0)),
        scratch_shapes=[pltpu.VMEM(w_ff.shape, jnp.bfloat16),
                        pltpu.SemaphoreType.DMA],
        compiler_params=pltpu.CompilerParams(dimension_semantics=("arbitrary",)),
    )(x2d, ctx2d, attn_bias, w_kv, w_qm, v_slab, w_ff)
    return out2d.reshape(B, N, d_out)


# ---------------------------------------------------------------------------
# Module-style params + pure-JAX reference
# ---------------------------------------------------------------------------
def init_params(key, d_in, d_ctx, d_head, d_expand, d_out, H):
    ks = jax.random.split(key, 12)

    def w(k, shape, s=0.02):
        return jax.random.normal(k, shape, jnp.float32) * s

    gq   = 1.0 + w(ks[0], (1, d_in), 0.1);   bgq  = w(ks[1], (1, d_in), 0.1)
    wq   = w(ks[2], (d_in, H * d_head));     bq   = w(ks[3], (1, H * d_head))
    gkv  = 1.0 + w(ks[4], (1, d_ctx), 0.1);  bgkv = w(ks[5], (1, d_ctx), 0.1)
    wkv  = w(ks[6], (d_ctx, H * (d_head + d_in))); bkv = w(ks[7], (1, H * (d_head + d_in)))
    wm   = w(ks[8], (H * d_in, d_in));       bm   = w(ks[9], (1, d_in))
    gf   = jnp.ones((1, d_in), jnp.float32); bgf  = jnp.zeros((1, d_in), jnp.float32)
    wf1  = w(ks[10], (d_in, d_expand));      bf1  = jnp.zeros((1, d_expand), jnp.float32)
    wf2  = w(ks[11], (d_expand, d_out));     bf2  = jnp.zeros((1, d_out), jnp.float32)
    wsc  = w(jax.random.fold_in(key, 99), (d_in, d_out)); bsc = jnp.zeros((1, d_out), jnp.float32)
    return (gq, bgq, wq, bq, gkv, bgkv, wkv, bkv, wm, bm,
            gf, bgf, wf1, bf1, wf2, bf2, wsc, bsc)


def reference(x, context, params, *, H, d_head, d_in):
    (gq, bgq, wq, bq, gkv, bgkv, wkv, bkv, wm, bm,
     gf, bgf, wf1, bf1, wf2, bf2, wsc, bsc) = params
    B, N, _ = x.shape
    M = context.shape[1]
    scale = float(d_head) ** -0.5

    def ln(v, g, b):
        mu = v.mean(-1, keepdims=True)
        var = ((v - mu) ** 2).mean(-1, keepdims=True)
        return (v - mu) / jnp.sqrt(var + LN_EPS) * g + b

    q = ln(x, gq, bgq) @ wq + bq
    kv = ln(context, gkv, bgkv) @ wkv + bkv
    k, v = kv[..., :H * d_head], kv[..., H * d_head:]
    qh = q.reshape(B, N, H, d_head).transpose(0, 2, 1, 3)
    kh = k.reshape(B, M, H, d_head).transpose(0, 2, 1, 3)
    vh = v.reshape(B, M, H, d_in).transpose(0, 2, 1, 3)
    attn = jnp.einsum('bhnc,bhmc->bhnm', qh, kh) * scale
    attn = jax.nn.softmax(attn, axis=-1)
    out = jnp.einsum('bhnm,bhmc->bhnc', attn, vh)
    out = out.transpose(0, 2, 1, 3).reshape(B, N, H * d_in)
    x2 = x + out @ wm + bm
    ff = jax.nn.gelu(ln(x2, gf, bgf) @ wf1 + bf1, approximate=False) @ wf2 + bf2
    return ff + x2 @ wsc + bsc


if __name__ == "__main__":
    B, N, M = 2, 8, 8
    d_in, d_ctx, d_head, d_expand, d_out, H = 32, 16, 8, 64, 48, 4

    key = jax.random.PRNGKey(0)
    kx, kc, kp = jax.random.split(key, 3)
    x = jax.random.normal(kx, (B, N, d_in), jnp.float32)
    context = jax.random.normal(kc, (B, M, d_ctx), jnp.float32)
    params = init_params(kp, d_in, d_ctx, d_head, d_expand, d_out, H)

    # one-time wrapper-side packing (bf16 + dense lane packing + wf2/wsc stacking)
    packed = pack_params(params, H=H, d_head=d_head, d_in=d_in, d_ctx=d_ctx,
                         d_expand=d_expand, d_out=d_out)

    out = cross_attention_block(x, context, packed, H=H, d_head=d_head, d_in=d_in,
                                d_ctx=d_ctx, d_expand=d_expand, d_out=d_out)
    out = jax.block_until_ready(out)

    ref = reference(x, context, params, H=H, d_head=d_head, d_in=d_in)
    # bf16 MXU operands + approx softmax reciprocal -> slightly looser than pure-f32 parity.
    np.testing.assert_allclose(np.asarray(out), np.asarray(ref), rtol=1e-2, atol=4e-3)
    print("KERNEL_OK")
</pallas_src>

<mosaic_0001>
module attributes {stable_mosaic.version = 11 : i64} {
  func.func @_cross_attn_kernel(%arg0: i32, %arg1: memref<16x32xf32, #tpu.memory_space<vmem>>, %arg2: memref<16x16xf32, #tpu.memory_space<vmem>>, %arg3: memref<16x16xf32, #tpu.memory_space<vmem>>, %arg4: memref<16x160xbf16, #tpu.memory_space<vmem>>, %arg5: memref<160x32xbf16, #tpu.memory_space<vmem>>, %arg6: memref<11x160xf32, #tpu.memory_space<vmem>>, %arg7: memref<128x64xbf16, #tpu.memory_space<any>>, %arg8: memref<16x48xf32, #tpu.memory_space<vmem>>, %arg9: memref<128x64xbf16, #tpu.memory_space<vmem>>, %arg10: memref<!tpu.dma_semaphore, #tpu.memory_space<semaphore_mem>>) attributes {dimension_semantics = [#tpu.dimension_semantics<arbitrary>], iteration_bounds = array<i64: 1>, scalar_prefetch = 0 : i64, scratch_operands = 2 : i64, tpu.core_type = #tpu.core_type<tc>, window_params = [{pipeline_mode = #tpu.pipeline_mode<synchronous>, transform_indices = @transform_0, window_bounds = array<i64: 16, 32>}, {pipeline_mode = #tpu.pipeline_mode<synchronous>, transform_indices = @transform_1, window_bounds = array<i64: 16, 16>}, {pipeline_mode = #tpu.pipeline_mode<synchronous>, transform_indices = @transform_2, window_bounds = array<i64: 16, 16>}, {pipeline_mode = #tpu.pipeline_mode<synchronous>, transform_indices = @transform_3, window_bounds = array<i64: 16, 160>}, {pipeline_mode = #tpu.pipeline_mode<synchronous>, transform_indices = @transform_4, window_bounds = array<i64: 160, 32>}, {pipeline_mode = #tpu.pipeline_mode<synchronous>, transform_indices = @transform_5, window_bounds = array<i64: 11, 160>}, {}, {pipeline_mode = #tpu.pipeline_mode<synchronous>, transform_indices = @transform_7, window_bounds = array<i64: 16, 48>}]} {
    tpu.enqueue_dma source(%arg7 : memref<128x64xbf16, #tpu.memory_space<any>>) target(%arg9 : memref<128x64xbf16, #tpu.memory_space<vmem>>) target_semaphore(%arg10 : memref<!tpu.dma_semaphore, #tpu.memory_space<semaphore_mem>>)
    %c0 = arith.constant 0 : index
    %c0_0 = arith.constant 0 : index
    %0 = vector.load %arg1[%c0, %c0_0] : memref<16x32xf32, #tpu.memory_space<vmem>>, vector<16x32xf32>
    %c0_1 = arith.constant 0 : index
    %c0_2 = arith.constant 0 : index
    %1 = vector.load %arg2[%c0_1, %c0_2] : memref<16x16xf32, #tpu.memory_space<vmem>>, vector<16x16xf32>
    %c0_3 = arith.constant 0 : index
    %c0_4 = arith.constant 0 : index
    %2 = vector.load %arg3[%c0_3, %c0_4] : memref<16x16xf32, #tpu.memory_space<vmem>>, vector<16x16xf32>
    %c0_5 = arith.constant 0 : index
    %c0_6 = arith.constant 0 : index
    %3 = vector.load %arg6[%c0_5, %c0_6] : memref<11x160xf32, #tpu.memory_space<vmem>>, vector<1x32xf32>
    %c1 = arith.constant 1 : index
    %c0_7 = arith.constant 0 : index
    %4 = vector.load %arg6[%c1, %c0_7] : memref<11x160xf32, #tpu.memory_space<vmem>>, vector<1x32xf32>
    %cst = arith.constant dense<0.000000e+00> : vector<16xf32>
    %5 = vector.multi_reduction <add>, %0, %cst [1] : vector<16x32xf32> to vector<16xf32>
    %6 = vector.shape_cast %5 : vector<16xf32> to vector<16x1xf32>
    %cst_8 = arith.constant 3.200000e+01 : f32
    %7 = vector.broadcast %cst_8 : f32 to vector<16x1xf32>
    %8 = arith.divf %6, %7 : vector<16x1xf32>
    %9 = vector.broadcast %8 : vector<16x1xf32> to vector<16x32xf32>
    %10 = arith.subf %0, %9 : vector<16x32xf32>
    %11 = arith.mulf %10, %10 : vector<16x32xf32>
    %cst_9 = arith.constant dense<0.000000e+00> : vector<16xf32>
    %12 = vector.multi_reduction <add>, %11, %cst_9 [1] : vector<16x32xf32> to vector<16xf32>
    %13 = vector.shape_cast %12 : vector<16xf32> to vector<16x1xf32>
    %cst_10 = arith.constant 3.200000e+01 : f32
    %14 = vector.broadcast %cst_10 : f32 to vector<16x1xf32>
    %15 = arith.divf %13, %14 : vector<16x1xf32>
    %16 = vector.broadcast %8 : vector<16x1xf32> to vector<16x32xf32>
    %17 = arith.subf %0, %16 : vector<16x32xf32>
    %cst_11 = arith.constant 9.99999974E-6 : f32
    %18 = vector.broadcast %cst_11 : f32 to vector<16x1xf32>
    %19 = arith.addf %15, %18 : vector<16x1xf32>
    %20 = math.rsqrt %19 : vector<16x1xf32>
    %21 = vector.broadcast %20 : vector<16x1xf32> to vector<16x32xf32>
    %22 = arith.mulf %17, %21 : vector<16x32xf32>
    %23 = vector.broadcast %3 : vector<1x32xf32> to vector<16x32xf32>
    %24 = arith.mulf %22, %23 : vector<16x32xf32>
    %25 = vector.broadcast %4 : vector<1x32xf32> to vector<16x32xf32>
    %26 = arith.addf %24, %25 : vector<16x32xf32>
    %27 = arith.truncf %26 : vector<16x32xf32> to vector<16x32xbf16>
    %c0_12 = arith.constant 0 : index
    %c0_13 = arith.constant 0 : index
    %28 = vector.load %arg5[%c0_12, %c0_13] : memref<160x32xbf16, #tpu.memory_space<vmem>>, vector<32x32xbf16>
    %cst_14 = arith.constant dense<0.000000e+00> : vector<16x32xf32>
    %29 = tpu.matmul %27, %28, %cst_14 {dimension_numbers = #tpu.dot_dimension_numbers<[1], [0], [0], [1], [0, 0, 1, 1], [], []>} : vector<16x32xbf16>, vector<32x32xbf16>, vector<16x32xf32> -> vector<16x32xf32>
    %c2 = arith.constant 2 : index
    %c0_15 = arith.constant 0 : index
    %30 = vector.load %arg6[%c2, %c0_15] : memref<11x160xf32, #tpu.memory_space<vmem>>, vector<1x32xf32>
    %31 = vector.broadcast %30 : vector<1x32xf32> to vector<16x32xf32>
    %32 = arith.addf %29, %31 : vector<16x32xf32>
    %c3 = arith.constant 3 : index
    %c0_16 = arith.constant 0 : index
    %33 = vector.load %arg6[%c3, %c0_16] : memref<11x160xf32, #tpu.memory_space<vmem>>, vector<1x16xf32>
    %c4 = arith.constant 4 : index
    %c0_17 = arith.constant 0 : index
    %34 = vector.load %arg6[%c4, %c0_17] : memref<11x160xf32, #tpu.memory_space<vmem>>, vector<1x16xf32>
    %cst_18 = arith.constant dense<0.000000e+00> : vector<16xf32>
    %35 = vector.multi_reduction <add>, %1, %cst_18 [1] : vector<16x16xf32> to vector<16xf32>
    %36 = vector.shape_cast %35 : vector<16xf32> to vector<16x1xf32>
    %cst_19 = arith.constant 1.600000e+01 : f32
    %37 = vector.broadcast %cst_19 : f32 to vector<16x1xf32>
    %38 = arith.divf %36, %37 : vector<16x1xf32>
    %39 = vector.broadcast %38 : vector<16x1xf32> to vector<16x16xf32>
    %40 = arith.subf %1, %39 : vector<16x16xf32>
    %41 = arith.mulf %40, %40 : vector<16x16xf32>
    %cst_20 = arith.constant dense<0.000000e+00> : vector<16xf32>
    %42 = vector.multi_reduction <add>, %41, %cst_20 [1] : vector<16x16xf32> to vector<16xf32>
    %43 = vector.shape_cast %42 : vector<16xf32> to vector<16x1xf32>
    %cst_21 = arith.constant 1.600000e+01 : f32
    %44 = vector.broadcast %cst_21 : f32 to vector<16x1xf32>
    %45 = arith.divf %43, %44 : vector<16x1xf32>
    %46 = vector.broadcast %38 : vector<16x1xf32> to vector<16x16xf32>
    %47 = arith.subf %1, %46 : vector<16x16xf32>
    %cst_22 = arith.constant 9.99999974E-6 : f32
    %48 = vector.broadcast %cst_22 : f32 to vector<16x1xf32>
    %49 = arith.addf %45, %48 : vector<16x1xf32>
    %50 = math.rsqrt %49 : vector<16x1xf32>
    %51 = vector.broadcast %50 : vector<16x1xf32> to vector<16x16xf32>
    %52 = arith.mulf %47, %51 : vector<16x16xf32>
    %53 = vector.broadcast %33 : vector<1x16xf32> to vector<16x16xf32>
    %54 = arith.mulf %52, %53 : vector<16x16xf32>
    %55 = vector.broadcast %34 : vector<1x16xf32> to vector<16x16xf32>
    %56 = arith.addf %54, %55 : vector<16x16xf32>
    %57 = arith.truncf %56 : vector<16x16xf32> to vector<16x16xbf16>
    %c0_23 = arith.constant 0 : index
    %c0_24 = arith.constant 0 : index
    %58 = vector.load %arg4[%c0_23, %c0_24] : memref<16x160xbf16, #tpu.memory_space<vmem>>, vector<16x160xbf16>
    %cst_25 = arith.constant dense<0.000000e+00> : vector<16x160xf32>
    %59 = tpu.matmul %57, %58, %cst_25 {dimension_numbers = #tpu.dot_dimension_numbers<[1], [0], [0], [1], [0, 0, 1, 1], [], []>} : vector<16x16xbf16>, vector<16x160xbf16>, vector<16x160xf32> -> vector<16x160xf32>
    %c5 = arith.constant 5 : index
    %c0_26 = arith.constant 0 : index
    %60 = vector.load %arg6[%c5, %c0_26] : memref<11x160xf32, #tpu.memory_space<vmem>>, vector<1x160xf32>
    %61 = vector.broadcast %60 : vector<1x160xf32> to vector<16x160xf32>
    %62 = arith.addf %59, %61 : vector<16x160xf32>
    %63 = vector.extract_strided_slice %62 {offsets = [0, 0], sizes = [16, 32], strides = [1, 1]} : vector<16x160xf32> to vector<16x32xf32>
    %64 = vector.extract_strided_slice %62 {offsets = [0, 32], sizes = [16, 128], strides = [1, 1]} : vector<16x160xf32> to vector<16x128xf32>
    %65 = arith.truncf %32 : vector<16x32xf32> to vector<16x32xbf16>
    %66 = arith.truncf %63 : vector<16x32xf32> to vector<16x32xbf16>
    %67 = arith.truncf %64 : vector<16x128xf32> to vector<16x128xbf16>
    %68 = vector.extract_strided_slice %65 {offsets = [0, 0], sizes = [16, 8], strides = [1, 1]} : vector<16x32xbf16> to vector<16x8xbf16>
    %69 = vector.extract_strided_slice %66 {offsets = [0, 0], sizes = [16, 8], strides = [1, 1]} : vector<16x32xbf16> to vector<16x8xbf16>
    %70 = vector.extract_strided_slice %67 {offsets = [0, 0], sizes = [16, 32], strides = [1, 1]} : vector<16x128xbf16> to vector<16x32xbf16>
    %cst_27 = arith.constant dense<0.000000e+00> : vector<16x16xf32>
    %71 = tpu.matmul %68, %69, %cst_27 {dimension_numbers = #tpu.dot_dimension_numbers<[1], [1], [0], [0], [0, 0, 1, 0], [], []>} : vector<16x8xbf16>, vector<16x8xbf16>, vector<16x16xf32> -> vector<16x16xf32>
    %cst_28 = arith.constant 0.353553385 : f32
    %72 = vector.broadcast %cst_28 : f32 to vector<16x16xf32>
    %73 = arith.mulf %71, %72 : vector<16x16xf32>
    %74 = arith.addf %73, %2 : vector<16x16xf32>
    %cst_29 = arith.constant dense<0xFF800000> : vector<16xf32>
    %75 = vector.multi_reduction <maximumf>, %74, %cst_29 [1] : vector<16x16xf32> to vector<16xf32>
    %76 = vector.shape_cast %75 : vector<16xf32> to vector<16x1xf32>
    %77 = vector.broadcast %76 : vector<16x1xf32> to vector<16x16xf32>
    %78 = arith.subf %74, %77 : vector<16x16xf32>
    %79 = math.exp %78 : vector<16x16xf32>
    %cst_30 = arith.constant dense<0.000000e+00> : vector<16xf32>
    %80 = vector.multi_reduction <add>, %79, %cst_30 [1] : vector<16x16xf32> to vector<16xf32>
    %81 = vector.shape_cast %80 : vector<16xf32> to vector<16x1xf32>
    %82 = tpu.reciprocal %81 {approx = true} : vector<16x1xf32> -> vector<16x1xf32>
    %83 = vector.broadcast %82 : vector<16x1xf32> to vector<16x16xf32>
    %84 = arith.mulf %79, %83 : vector<16x16xf32>
    %85 = arith.truncf %84 : vector<16x16xf32> to vector<16x16xbf16>
    %cst_31 = arith.constant dense<0.000000e+00> : vector<16x32xf32>
    %86 = tpu.matmul %85, %70, %cst_31 {dimension_numbers = #tpu.dot_dimension_numbers<[1], [0], [0], [1], [0, 0, 1, 1], [], []>} : vector<16x16xbf16>, vector<16x32xbf16>, vector<16x32xf32> -> vector<16x32xf32>
    %87 = vector.extract_strided_slice %65 {offsets = [0, 8], sizes = [16, 8], strides = [1, 1]} : vector<16x32xbf16> to vector<16x8xbf16>
    %88 = vector.extract_strided_slice %66 {offsets = [0, 8], sizes = [16, 8], strides = [1, 1]} : vector<16x32xbf16> to vector<16x8xbf16>
    %89 = vector.extract_strided_slice %67 {offsets = [0, 32], sizes = [16, 32], strides = [1, 1]} : vector<16x128xbf16> to vector<16x32xbf16>
    %cst_32 = arith.constant dense<0.000000e+00> : vector<16x16xf32>
    %90 = tpu.matmul %87, %88, %cst_32 {dimension_numbers = #tpu.dot_dimension_numbers<[1], [1], [0], [0], [0, 0, 1, 0], [], []>} : vector<16x8xbf16>, vector<16x8xbf16>, vector<16x16xf32> -> vector<16x16xf32>
    %cst_33 = arith.constant 0.353553385 : f32
    %91 = vector.broadcast %cst_33 : f32 to vector<16x16xf32>
    %92 = arith.mulf %90, %91 : vector<16x16xf32>
    %93 = arith.addf %92, %2 : vector<16x16xf32>
    %cst_34 = arith.constant dense<0xFF800000> : vector<16xf32>
    %94 = vector.multi_reduction <maximumf>, %93, %cst_34 [1] : vector<16x16xf32> to vector<16xf32>
    %95 = vector.shape_cast %94 : vector<16xf32> to vector<16x1xf32>
    %96 = vector.broadcast %95 : vector<16x1xf32> to vector<16x16xf32>
    %97 = arith.subf %93, %96 : vector<16x16xf32>
    %98 = math.exp %97 : vector<16x16xf32>
    %cst_35 = arith.constant dense<0.000000e+00> : vector<16xf32>
    %99 = vector.multi_reduction <add>, %98, %cst_35 [1] : vector<16x16xf32> to vector<16xf32>
    %100 = vector.shape_cast %99 : vector<16xf32> to vector<16x1xf32>
    %101 = tpu.reciprocal %100 {approx = true} : vector<16x1xf32> -> vector<16x1xf32>
    %102 = vector.broadcast %101 : vector<16x1xf32> to vector<16x16xf32>
    %103 = arith.mulf %98, %102 : vector<16x16xf32>
    %104 = arith.truncf %103 : vector<16x16xf32> to vector<16x16xbf16>
    %cst_36 = arith.constant dense<0.000000e+00> : vector<16x32xf32>
    %105 = tpu.matmul %104, %89, %cst_36 {dimension_numbers = #tpu.dot_dimension_numbers<[1], [0], [0], [1], [0, 0, 1, 1], [], []>} : vector<16x16xbf16>, vector<16x32xbf16>, vector<16x32xf32> -> vector<16x32xf32>
    %106 = vector.extract_strided_slice %65 {offsets = [0, 16], sizes = [16, 8], strides = [1, 1]} : vector<16x32xbf16> to vector<16x8xbf16>
    %107 = vector.extract_strided_slice %66 {offsets = [0, 16], sizes = [16, 8], strides = [1, 1]} : vector<16x32xbf16> to vector<16x8xbf16>
    %108 = vector.extract_strided_slice %67 {offsets = [0, 64], sizes = [16, 32], strides = [1, 1]} : vector<16x128xbf16> to vector<16x32xbf16>
    %cst_37 = arith.constant dense<0.000000e+00> : vector<16x16xf32>
    %109 = tpu.matmul %106, %107, %cst_37 {dimension_numbers = #tpu.dot_dimension_numbers<[1], [1], [0], [0], [0, 0, 1, 0], [], []>} : vector<16x8xbf16>, vector<16x8xbf16>, vector<16x16xf32> -> vector<16x16xf32>
    %cst_38 = arith.constant 0.353553385 : f32
    %110 = vector.broadcast %cst_38 : f32 to vector<16x16xf32>
    %111 = arith.mulf %109, %110 : vector<16x16xf32>
    %112 = arith.addf %111, %2 : vector<16x16xf32>
    %cst_39 = arith.constant dense<0xFF800000> : vector<16xf32>
    %113 = vector.multi_reduction <maximumf>, %112, %cst_39 [1] : vector<16x16xf32> to vector<16xf32>
    %114 = vector.shape_cast %113 : vector<16xf32> to vector<16x1xf32>
    %115 = vector.broadcast %114 : vector<16x1xf32> to vector<16x16xf32>
    %116 = arith.subf %112, %115 : vector<16x16xf32>
    %117 = math.exp %116 : vector<16x16xf32>
    %cst_40 = arith.constant dense<0.000000e+00> : vector<16xf32>
    %118 = vector.multi_reduction <add>, %117, %cst_40 [1] : vector<16x16xf32> to vector<16xf32>
    %119 = vector.shape_cast %118 : vector<16xf32> to vector<16x1xf32>
    %120 = tpu.reciprocal %119 {approx = true} : vector<16x1xf32> -> vector<16x1xf32>
    %121 = vector.broadcast %120 : vector<16x1xf32> to vector<16x16xf32>
    %122 = arith.mulf %117, %121 : vector<16x16xf32>
    %123 = arith.truncf %122 : vector<16x16xf32> to vector<16x16xbf16>
    %cst_41 = arith.constant dense<0.000000e+00> : vector<16x32xf32>
    %124 = tpu.matmul %123, %108, %cst_41 {dimension_numbers = #tpu.dot_dimension_numbers<[1], [0], [0], [1], [0, 0, 1, 1], [], []>} : vector<16x16xbf16>, vector<16x32xbf16>, vector<16x32xf32> -> vector<16x32xf32>
    %125 = vector.extract_strided_slice %65 {offsets = [0, 24], sizes = [16, 8], strides = [1, 1]} : vector<16x32xbf16> to vector<16x8xbf16>
    %126 = vector.extract_strided_slice %66 {offsets = [0, 24], sizes = [16, 8], strides = [1, 1]} : vector<16x32xbf16> to vector<16x8xbf16>
    %127 = vector.extract_strided_slice %67 {offsets = [0, 96], sizes = [16, 32], strides = [1, 1]} : vector<16x128xbf16> to vector<16x32xbf16>
    %cst_42 = arith.constant dense<0.000000e+00> : vector<16x16xf32>
    %128 = tpu.matmul %125, %126, %cst_42 {dimension_numbers = #tpu.dot_dimension_numbers<[1], [1], [0], [0], [0, 0, 1, 0], [], []>} : vector<16x8xbf16>, vector<16x8xbf16>, vector<16x16xf32> -> vector<16x16xf32>
    %cst_43 = arith.constant 0.353553385 : f32
    %129 = vector.broadcast %cst_43 : f32 to vector<16x16xf32>
    %130 = arith.mulf %128, %129 : vector<16x16xf32>
    %131 = arith.addf %130, %2 : vector<16x16xf32>
    %cst_44 = arith.constant dense<0xFF800000> : vector<16xf32>
    %132 = vector.multi_reduction <maximumf>, %131, %cst_44 [1] : vector<16x16xf32> to vector<16xf32>
    %133 = vector.shape_cast %132 : vector<16xf32> to vector<16x1xf32>
    %134 = vector.broadcast %133 : vector<16x1xf32> to vector<16x16xf32>
    %135 = arith.subf %131, %134 : vector<16x16xf32>
    %136 = math.exp %135 : vector<16x16xf32>
    %cst_45 = arith.constant dense<0.000000e+00> : vector<16xf32>
    %137 = vector.multi_reduction <add>, %136, %cst_45 [1] : vector<16x16xf32> to vector<16xf32>
    %138 = vector.shape_cast %137 : vector<16xf32> to vector<16x1xf32>
    %139 = tpu.reciprocal %138 {approx = true} : vector<16x1xf32> -> vector<16x1xf32>
    %140 = vector.broadcast %139 : vector<16x1xf32> to vector<16x16xf32>
    %141 = arith.mulf %136, %140 : vector<16x16xf32>
    %142 = arith.truncf %141 : vector<16x16xf32> to vector<16x16xbf16>
    %cst_46 = arith.constant dense<0.000000e+00> : vector<16x32xf32>
    %143 = tpu.matmul %142, %127, %cst_46 {dimension_numbers = #tpu.dot_dimension_numbers<[1], [0], [0], [1], [0, 0, 1, 1], [], []>} : vector<16x16xbf16>, vector<16x32xbf16>, vector<16x32xf32> -> vector<16x32xf32>
    %144 = tpu.concatenate %86, %105, %124, %143 in 1 : vector<16x32xf32>, vector<16x32xf32>, vector<16x32xf32>, vector<16x32xf32> -> vector<16x128xf32>
    %145 = arith.truncf %144 : vector<16x128xf32> to vector<16x128xbf16>
    %c32 = arith.constant 32 : index
    %c0_47 = arith.constant 0 : index
    %146 = vector.load %arg5[%c32, %c0_47] : memref<160x32xbf16, #tpu.memory_space<vmem>>, vector<128x32xbf16>
    %cst_48 = arith.constant dense<0.000000e+00> : vector<16x32xf32>
    %147 = tpu.matmul %145, %146, %cst_48 {dimension_numbers = #tpu.dot_dimension_numbers<[1], [0], [0], [1], [0, 0, 1, 1], [], []>} : vector<16x128xbf16>, vector<128x32xbf16>, vector<16x32xf32> -> vector<16x32xf32>
    %148 = arith.addf %0, %147 : vector<16x32xf32>
    %c6 = arith.constant 6 : index
    %c0_49 = arith.constant 0 : index
    %149 = vector.load %arg6[%c6, %c0_49] : memref<11x160xf32, #tpu.memory_space<vmem>>, vector<1x32xf32>
    %150 = vector.broadcast %149 : vector<1x32xf32> to vector<16x32xf32>
    %151 = arith.addf %148, %150 : vector<16x32xf32>
    tpu.wait_dma2 semaphore(%arg10 : memref<!tpu.dma_semaphore, #tpu.memory_space<semaphore_mem>>) src(%arg7 : memref<128x64xbf16, #tpu.memory_space<any>>) dst(%arg9 : memref<128x64xbf16, #tpu.memory_space<vmem>>)
    %c7 = arith.constant 7 : index
    %c0_50 = arith.constant 0 : index
    %152 = vector.load %arg6[%c7, %c0_50] : memref<11x160xf32, #tpu.memory_space<vmem>>, vector<1x32xf32>
    %c8 = arith.constant 8 : index
    %c0_51 = arith.constant 0 : index
    %153 = vector.load %arg6[%c8, %c0_51] : memref<11x160xf32, #tpu.memory_space<vmem>>, vector<1x32xf32>
    %cst_52 = arith.constant dense<0.000000e+00> : vector<16xf32>
    %154 = vector.multi_reduction <add>, %151, %cst_52 [1] : vector<16x32xf32> to vector<16xf32>
    %155 = vector.shape_cast %154 : vector<16xf32> to vector<16x1xf32>
    %cst_53 = arith.constant 3.200000e+01 : f32
    %156 = vector.broadcast %cst_53 : f32 to vector<16x1xf32>
    %157 = arith.divf %155, %156 : vector<16x1xf32>
    %158 = vector.broadcast %157 : vector<16x1xf32> to vector<16x32xf32>
    %159 = arith.subf %151, %158 : vector<16x32xf32>
    %160 = arith.mulf %159, %159 : vector<16x32xf32>
    %cst_54 = arith.constant dense<0.000000e+00> : vector<16xf32>
    %161 = vector.multi_reduction <add>, %160, %cst_54 [1] : vector<16x32xf32> to vector<16xf32>
    %162 = vector.shape_cast %161 : vector<16xf32> to vector<16x1xf32>
    %cst_55 = arith.constant 3.200000e+01 : f32
    %163 = vector.broadcast %cst_55 : f32 to vector<16x1xf32>
    %164 = arith.divf %162, %163 : vector<16x1xf32>
    %165 = vector.broadcast %157 : vector<16x1xf32> to vector<16x32xf32>
    %166 = arith.subf %151, %165 : vector<16x32xf32>
    %cst_56 = arith.constant 9.99999974E-6 : f32
    %167 = vector.broadcast %cst_56 : f32 to vector<16x1xf32>
    %168 = arith.addf %164, %167 : vector<16x1xf32>
    %169 = math.rsqrt %168 : vector<16x1xf32>
    %170 = vector.broadcast %169 : vector<16x1xf32> to vector<16x32xf32>
    %171 = arith.mulf %166, %170 : vector<16x32xf32>
    %172 = vector.broadcast %152 : vector<1x32xf32> to vector<16x32xf32>
    %173 = arith.mulf %171, %172 : vector<16x32xf32>
    %174 = vector.broadcast %153 : vector<1x32xf32> to vector<16x32xf32>
    %175 = arith.addf %173, %174 : vector<16x32xf32>
    %176 = arith.truncf %175 : vector<16x32xf32> to vector<16x32xbf16>
    %c0_57 = arith.constant 0 : index
    %c0_58 = arith.constant 0 : index
    %177 = vector.load %arg9[%c0_57, %c0_58] : memref<128x64xbf16, #tpu.memory_space<vmem>>, vector<32x64xbf16>
    %cst_59 = arith.constant dense<0.000000e+00> : vector<16x64xf32>
    %178 = tpu.matmul %176, %177, %cst_59 {dimension_numbers = #tpu.dot_dimension_numbers<[1], [0], [0], [1], [0, 0, 1, 1], [], []>} : vector<16x32xbf16>, vector<32x64xbf16>, vector<16x64xf32> -> vector<16x64xf32>
    %c9 = arith.constant 9 : index
    %c0_60 = arith.constant 0 : index
    %179 = vector.load %arg6[%c9, %c0_60] : memref<11x160xf32, #tpu.memory_space<vmem>>, vector<1x64xf32>
    %180 = vector.broadcast %179 : vector<1x64xf32> to vector<16x64xf32>
    %181 = arith.addf %178, %180 : vector<16x64xf32>
    %cst_61 = arith.constant 5.000000e-01 : f32
    %182 = vector.broadcast %cst_61 : f32 to vector<16x64xf32>
    %183 = arith.mulf %182, %181 : vector<16x64xf32>
    %cst_62 = arith.constant 0.707106769 : f32
    %184 = vector.broadcast %cst_62 : f32 to vector<16x64xf32>
    %185 = arith.mulf %181, %184 : vector<16x64xf32>
    %186 = math.absf %185 : vector<16x64xf32>
    %cst_63 = arith.constant 0.327591091 : f32
    %187 = vector.broadcast %cst_63 : f32 to vector<16x64xf32>
    %188 = arith.mulf %187, %186 : vector<16x64xf32>
    %cst_64 = arith.constant 1.000000e+00 : f32
    %189 = vector.broadcast %cst_64 : f32 to vector<16x64xf32>
    %190 = arith.addf %189, %188 : vector<16x64xf32>
    %cst_65 = arith.constant 1.000000e+00 : f32
    %191 = vector.broadcast %cst_65 : f32 to vector<16x64xf32>
    %192 = arith.divf %191, %190 : vector<16x64xf32>
    %cst_66 = arith.constant 1.06140542 : f32
    %193 = vector.broadcast %cst_66 : f32 to vector<16x64xf32>
    %194 = arith.mulf %193, %192 : vector<16x64xf32>
    %cst_67 = arith.constant -1.45315206 : f32
    %195 = vector.broadcast %cst_67 : f32 to vector<16x64xf32>
    %196 = arith.addf %194, %195 : vector<16x64xf32>
    %197 = arith.mulf %196, %192 : vector<16x64xf32>
    %cst_68 = arith.constant 1.42141378 : f32
    %198 = vector.broadcast %cst_68 : f32 to vector<16x64xf32>
    %199 = arith.addf %197, %198 : vector<16x64xf32>
    %200 = arith.mulf %199, %192 : vector<16x64xf32>
    %cst_69 = arith.constant -0.284496725 : f32
    %201 = vector.broadcast %cst_69 : f32 to vector<16x64xf32>
    %202 = arith.addf %200, %201 : vector<16x64xf32>
    %203 = arith.mulf %202, %192 : vector<16x64xf32>
    %cst_70 = arith.constant 0.254829586 : f32
    %204 = vector.broadcast %cst_70 : f32 to vector<16x64xf32>
    %205 = arith.addf %203, %204 : vector<16x64xf32>
    %206 = arith.mulf %205, %192 : vector<16x64xf32>
    %cst_71 = arith.constant 0.000000e+00 : f32
    %207 = vector.broadcast %cst_71 : f32 to vector<16x64xf32>
    %208 = arith.subf %207, %186 : vector<16x64xf32>
    %209 = arith.mulf %208, %186 : vector<16x64xf32>
    %210 = math.exp %209 : vector<16x64xf32>
    %211 = arith.mulf %206, %210 : vector<16x64xf32>
    %cst_72 = arith.constant 1.000000e+00 : f32
    %212 = vector.broadcast %cst_72 : f32 to vector<16x64xf32>
    %213 = arith.subf %212, %211 : vector<16x64xf32>
    %cst_73 = arith.constant 0.000000e+00 : f32
    %214 = vector.broadcast %cst_73 : f32 to vector<16x64xf32>
    %215 = arith.cmpf oge, %185, %214 : vector<16x64xf32>
    %cst_74 = arith.constant 0.000000e+00 : f32
    %216 = vector.broadcast %cst_74 : f32 to vector<16x64xf32>
    %217 = arith.subf %216, %213 : vector<16x64xf32>
    %218 = arith.select %215, %213, %217 : vector<16x64xi1>, vector<16x64xf32>
    %cst_75 = arith.constant 1.000000e+00 : f32
    %219 = vector.broadcast %cst_75 : f32 to vector<16x64xf32>
    %220 = arith.addf %219, %218 : vector<16x64xf32>
    %221 = arith.mulf %183, %220 : vector<16x64xf32>
    %222 = tpu.concatenate %221, %151 in 1 : vector<16x64xf32>, vector<16x32xf32> -> vector<16x96xf32>
    %223 = arith.truncf %222 : vector<16x96xf32> to vector<16x96xbf16>
    %c32_76 = arith.constant 32 : index
    %c0_77 = arith.constant 0 : index
    %224 = vector.load %arg9[%c32_76, %c0_77] : memref<128x64xbf16, #tpu.memory_space<vmem>>, vector<96x48xbf16>
    %cst_78 = arith.constant dense<0.000000e+00> : vector<16x48xf32>
    %225 = tpu.matmul %223, %224, %cst_78 {dimension_numbers = #tpu.dot_dimension_numbers<[1], [0], [0], [1], [0, 0, 1, 1], [], []>} : vector<16x96xbf16>, vector<96x48xbf16>, vector<16x48xf32> -> vector<16x48xf32>
    %c10 = arith.constant 10 : index
    %c0_79 = arith.constant 0 : index
    %226 = vector.load %arg6[%c10, %c0_79] : memref<11x160xf32, #tpu.memory_space<vmem>>, vector<1x48xf32>
    %227 = vector.broadcast %226 : vector<1x48xf32> to vector<16x48xf32>
    %228 = arith.addf %225, %227 : vector<16x48xf32>
    %c0_80 = arith.constant 0 : index
    %c0_81 = arith.constant 0 : index
    %229 = vector.load %arg8[%c0_80, %c0_81] : memref<16x48xf32, #tpu.memory_space<vmem>>, vector<16x48xf32>
    tpu.vector_store %arg8[%c0_80, %c0_81], %228 {strides = array<i32>} : memref<16x48xf32, #tpu.memory_space<vmem>>, vector<16x48xf32>,
    return
  }
  func.func @transform_0(%arg0: i32) -> (i32, i32) {
    %c0_i32 = arith.constant 0 : i32
    %c0_i32_0 = arith.constant 0 : i32
    %c0_i32_1 = arith.constant 0 : i32
    return %c0_i32, %c0_i32_0 : i32, i32
  }
  func.func @transform_1(%arg0: i32) -> (i32, i32) {
    %c0_i32 = arith.constant 0 : i32
    %c0_i32_0 = arith.constant 0 : i32
    %c0_i32_1 = arith.constant 0 : i32
    return %c0_i32, %c0_i32_0 : i32, i32
  }
  func.func @transform_2(%arg0: i32) -> (i32, i32) {
    %c0_i32 = arith.constant 0 : i32
    %c0_i32_0 = arith.constant 0 : i32
    %c0_i32_1 = arith.constant 0 : i32
    return %c0_i32, %c0_i32_0 : i32, i32
  }
  func.func @transform_3(%arg0: i32) -> (i32, i32) {
    %c0_i32 = arith.constant 0 : i32
    %c0_i32_0 = arith.constant 0 : i32
    %c0_i32_1 = arith.constant 0 : i32
    return %c0_i32, %c0_i32_0 : i32, i32
  }
  func.func @transform_4(%arg0: i32) -> (i32, i32) {
    %c0_i32 = arith.constant 0 : i32
    %c0_i32_0 = arith.constant 0 : i32
    %c0_i32_1 = arith.constant 0 : i32
    return %c0_i32, %c0_i32_0 : i32, i32
  }
  func.func @transform_5(%arg0: i32) -> (i32, i32) {
    %c0_i32 = arith.constant 0 : i32
    %c0_i32_0 = arith.constant 0 : i32
    %c0_i32_1 = arith.constant 0 : i32
    return %c0_i32, %c0_i32_0 : i32, i32
  }
  func.func @transform_7(%arg0: i32) -> (i32, i32) {
    %c0_i32 = arith.constant 0 : i32
    %c0_i32_0 = arith.constant 0 : i32
    %c0_i32_1 = arith.constant 0 : i32
    return %c0_i32, %c0_i32_0 : i32, i32
  }
}

</mosaic_0001>

<bundles_post_ra>
// kernel: tpu_custom_call.1
= control target key start
LH: loop header
LB: loop body
LE: loop exit
PB: predicated region body
PF: predicated region fallthrough
CT: control target
= control target key end

     0   :  { %12 = vsyncpa [#allocation5], 0  ;;  %vm186_vm0 = vcmask 130048   ;;  %vm90_vm1 = vcmask 261120   ;;  %s1800_s0 = inlined_call_operand.vmem [shape: f32[16,32], index: 0, kind: input, shape index: {}]   ;;  %s1801_s1 = inlined_call_operand.vmem [shape: f32[16,16], index: 1, kind: input, shape index: {}]   ;;  %s1802_s2 = inlined_call_operand.vmem [shape: f32[16,16], index: 2, kind: input, shape index: {}]   ;;  %s1803_s3 = inlined_call_operand.vmem [shape: bf16[16,160], index: 3, kind: input, shape index: {}]   ;;  %s1804_s4 = inlined_call_operand.vmem [shape: bf16[160,32], index: 4, kind: input, shape index: {}]   ;;  %s1805_s5 = inlined_call_operand.vmem [shape: f32[11,160], index: 5, kind: input, shape index: {}]   ;;  %s1806_s6 = inlined_call_operand.vmem [shape: bf16[128,64], index: 6, kind: input, shape index: {}]   ;;  %s1807_s7 = inlined_call_operand.hbm [shape: f32[16,48], index: 7, kind: output, shape index: {}]  }
   0x1   :  { %v1507_v0 = vld [vmem:[%s1806_s6] sm:$0xff]  ;;  %v1512_v1 = vld [vmem:[%s1806_s6 + $0x8] sm:$0xff]  ;;  %v1517_v2 = vld [vmem:[%s1806_s6 + $0x10] sm:$0xff] }
   0x2   :  { %v1522_v3 = vld [vmem:[%s1806_s6 + $0x18] sm:$0xff]  ;;  %v1527_v4 = vld [vmem:[%s1806_s6 + $0x20] sm:$0xff]  ;;  %v1532_v5 = vld [vmem:[%s1806_s6 + $0x28] sm:$0xff] }
   0x3   :  { %v1537_v6 = vld [vmem:[%s1806_s6 + $0x30] sm:$0xff]  ;;  %v1542_v7 = vld [vmem:[%s1806_s6 + $0x38] sm:$0xff]  ;;  %v84_v8 = vld [vmem:[%s1801_s1] sm:$0xff] }
   0x4   :  { %v85_v9 = vld [vmem:[%s1801_s1 + $0x8] sm:$0xff]  ;;  %v1553_v10 = vld [vmem:[%s1800_s0] sm:$0xff]  ;;  %v187_v11 = vsel %vm186_vm0, %v84_v8, 0.0 }
   0x5   :  { %v91_v12 = vsel %vm90_vm1, %v1553_v10, 0.0  ;;  %v1561_v13 = vld [vmem:[%s1800_s0 + $0x8] sm:$0xff] }
   0x6   :  { %81 = vsyncadd [#allocation3], 1024  ;;  %188 = vadd.xlane.f32.xlu0 %v187_v11  ;;  %v190_v14 = vsel %vm186_vm0, %v85_v9, 0.0  ;;  %92 = vadd.xlane.f32.xlu1 %v91_v12  ;;  %v94_v15 = vsel %vm90_vm1, %v1561_v13, 0.0  ;;  %v1356_v36 = vld [vmem:[%s1803_s3 + $0x4] ss:$8 sps:$4 sm:$0xff]  }
   0x7   :  { %v1358_v37 = vld [vmem:[%s1804_s4] sm:$0xff]   ;;  %v1452_v39 = vmov 0.0   ;;  %247 = vmatprep.subr.bf16.mxu1 %v1356_v36  ;;  %v1453_v40 = vmov 0   ;;  %v1360_v41 = vld [vmem:[%s1804_s4 + $0x8] sm:$0xff]   ;;  %vm1454_vm2 = vmmov 0   ;;  %vm293_vm3 = vcmask 64512  }
   0x8   :  { %v1359_v38 = vld [vmem:[%s1803_s3] ss:$8 sps:$4 sm:$0xff]   ;;  %1229 = vmatprep.subr.bf16.mxu0 %v1452_v39  ;;  %279 = vmatprep.mubr.bf16.mxu1 %v1453_v40  ;;  %v185_v63 = vld [vmem:[%s1805_s5 + $0x4] ss:$0 sm:$0xff]  ;;  %s1455_s18 = smov 120   ;;  %s1456_s19 = smov 104  }
   0x9   :  { %1230 = vmatpush3.bf16.msra.mxu0 %v1358_v37  ;;  %248 = vmatpush1.bf16.msra.mxu1 %v1359_v38  ;;  %v184_v56 = vld [vmem:[%s1805_s5 + $0x3] ss:$0 sm:$0xff]  ;;  %v88_v62 = vld [vmem:[%s1805_s5] ss:$0 sm:$0xff]  ;;  %s1457_s20 = smov 112   ;;  %s1459_s0 = smov 96  }
   0xa   :  { %191 = vadd.xlane.f32.xlu0 %v190_v14  ;;  %95 = vadd.xlane.f32.xlu1 %v94_v15  ;;  %s1460_s1 = smov 32   ;;  %vm815_vm4 = vcmask 523264   ;;  %vm818_vm5 = vcmask 785408  }
   0xb   :  { %1231 = vmatprep.subr.bf16.mxu0 %v1452_v39  ;;  %1237 = vmatprep.subr.bf16.mxu1 %v1452_v39 }
   0xc   :  { %1233 = vmatprep.mubr.msk.bf16.mxu0 %vm1454_vm2, %v1452_v39 }
   0xd   :  { %1232 = vmatpush3.bf16.msra.mxu0 %v1360_v41 }
   0xe   :  { %1243 = vmatprep.subr.bf16.mxu0 %v1452_v39 }
  0x93   :  { %v189_v16 = vpop.xlane.xlu0 %188  ;;  %v93_v17 = vpop.xlane.xlu1 %92 }
  0x94   :  { %v194_v18 = vmul.f32 0.0625, %v189_v16  ;;  %v98_v19 = vmul.f32 0.03125, %v93_v17  ;;  %v89_v16 = vld [vmem:[%s1805_s5 + $0x1] ss:$0 sm:$0xff] }
  0x96   :  { %v196_v20 = vsub.f32 %v84_v8, %v194_v18  ;;  %v100_v21 = vsub.f32 %v1553_v10, %v98_v19 }
  0x97   :  { %v192_v22 = vpop.xlane.xlu0 %191  ;;  %v96_v23 = vpop.xlane.xlu1 %95 }
  0x98   :  { %v195_v24 = vmul.f32 0.0625, %v192_v22  ;;  %v198_v25 = vmul.f32 %v196_v20, %v196_v20  ;;  %v99_v26 = vmul.f32 0.03125, %v96_v23  ;;  %v102_v27 = vmul.f32 %v100_v21, %v100_v21 }
  0x99   :  { %v224_v22 = vlaneseq }
  0x9a   :  { %v197_v28 = vsub.f32 %v85_v9, %v195_v24  ;;  %v200_v29 = vsel %vm186_vm0, %v198_v25, 0.0  ;;  %v101_v30 = vsub.f32 %v1561_v13, %v99_v26  ;;  %v104_v32 = vsel %vm90_vm1, %v102_v27, 0.0  ;;  %v1168_v25 = vld [vmem:[%s1805_s5 + $0x5] ss:$8 sm:$0x3] }
  0x9b   :  { %201 = vadd.xlane.f32.xlu0 %v200_v29  ;;  %v225_v23 = vshrl.u32 %v224_v22, 7 }
  0x9c   :  { %v199_v31 = vmul.f32 %v197_v28, %v197_v28  ;;  %v103_v33 = vmul.f32 %v101_v30, %v101_v30 }
  0x9d   :  { %v226_v24 = vsub.s32 0, %v225_v23  ;;  %v230_v26 = vsub.s32 1, %v225_v23 }
  0x9e   :  { %v203_v34 = vsel %vm186_vm0, %v199_v31, 0.0  ;;  %v107_v35 = vsel %vm90_vm1, %v103_v33, 0.0 }
  0x9f   :  { %204 = vadd.xlane.f32.xlu1 %v203_v34  ;;  %105 = vadd.xlane.f32.xlu0 %v104_v32  ;;  %v227_v27 = vrot.slane %v1168_v25, %v226_v24  ;;  %v231_v29 = vrot.slane %v1168_v25, %v230_v26 }
  0xa3   :  { %108 = vadd.xlane.f32.xlu1 %v107_v35  ;;  %v127_v35 = vld [vmem:[%s1805_s5 + $0x2] ss:$0 sm:$0xff] }
 0x128   :  { %v202_v42 = vpop.xlane.xlu0 %201 }
 0x129   :  { %v206_v43 = vmul.f32 0.0625, %v202_v42 }
 0x12b   :  { %v208_v44 = vadd.f32 1e-05, %v206_v43 }
 0x12c   :  { %v106_v45 = vpop.xlane.xlu0 %105  ;;  %v205_v46 = vpop.xlane.xlu1 %204 }
 0x12d   :  { %1369 = vrsqrt.f32 %v208_v44  ;;  %v110_v47 = vmul.f32 0.03125, %v106_v45  ;;  %v207_v48 = vmul.f32 0.0625, %v205_v46 }
 0x12f   :  { %v112_v49 = vadd.f32 1e-05, %v110_v47  ;;  %v209_v50 = vadd.f32 1e-05, %v207_v48 }
 0x130   :  { %v109_v51 = vpop.xlane.xlu1 %108 }
 0x131   :  { %1371 = vrsqrt.f32 %v112_v49  ;;  %v111_v52 = vmul.f32 0.03125, %v109_v51 }
 0x132   :  { %1373 = vrsqrt.f32 %v209_v50 }
 0x133   :  { %v113_v53 = vadd.f32 1e-05, %v111_v52 }
 0x135   :  { %1375 = vrsqrt.f32 %v113_v53 }
 0x137   :  { %v1370_v54 = vpop.eup %1369 }
 0x138   :  { %v212_v55 = vmul.f32 %v1370_v54, %v196_v20 }
 0x13a   :  { %v214_v61 = vmul.f32 %v212_v55, %v184_v56 }
 0x13b   :  { %v1372_v57 = vpop.eup %1371 }
 0x13c   :  { %v1374_v58 = vpop.eup %1373  ;;  %v116_v59 = vmul.f32 %v1372_v57, %v100_v21  ;;  %v216_v14 = vadd.f32 %v214_v61, %v185_v63 }
 0x13d   :  { %v213_v60 = vmul.f32 %v1374_v58, %v197_v28 }
 0x13e   :  { %v118_v12 = vmul.f32 %v116_v59, %v88_v62  ;;  %v86_v59 = vld [vmem:[%s1802_s2] sm:$0xff] }
 0x13f   :  { %v1376_v8 = vpop.eup %1375  ;;  %v215_v9 = vmul.f32 %v213_v60, %v184_v56 }
 0x140   :  { %v117_v11 = vmul.f32 %v1376_v8, %v101_v30  ;;  %v120_v19 = vadd.f32 %v118_v12, %v89_v16 }
 0x141   :  { %v217_v15 = vadd.f32 %v215_v9, %v185_v63  ;;  %v87_v63 = vld [vmem:[%s1802_s2 + $0x8] sm:$0xff]  ;;  %s1458_s2 = smov 64  }
 0x142   :  { %v119_v17 = vmul.f32 %v117_v11, %v88_v62 }
 0x143   :  { %v218_v18 = vpack.c.bf16 %v217_v15, %v216_v14 }
 0x144   :  { %v121_v20 = vadd.f32 %v119_v17, %v89_v16 }
 0x145   :  { %1171 = vmatmul.mubr.msk.bf16.vlgmr.msra.gmra.mrb[0].mxu1 %vm186_vm0, %v218_v18 }
 0x146   :  { %v122_v21 = vpack.c.bf16 %v121_v20, %v120_v19  ;;  %1239 = vmatprep.mubr.msk.bf16.mxu1 %vm1454_vm2, %v1452_v39 }
 0x148   :  { %1234 = vmatmul.mubr.msk.bf16.vlgmr.msra.gmra.mrb[0].mxu0 %vm90_vm1, %v122_v21 }
 0x149   :  { %1245 = vmatprep.mubr.msk.bf16.mxu0 %vm1454_vm2, %v1452_v39 }
 0x218   :  { %v281_v28 = vpop.f32.mrb[0].mxu1 }
 0x219   :  { %v283_v30 = vpop.f32.mrb[1].mxu1  ;;  %v282_v32 = vadd.f32 %v281_v28, %v227_v27 }
 0x21a   :  { %v285_v31 = vpop.f32.mrb[2].mxu1  ;;  %v1614_v37 = vadd.f32 %v283_v30, %v231_v29 }
 0x21b   :  { %v286_v33 = vadd.f32 %v285_v31, %v227_v27  ;;  %v287_v34 = vpop.f32.mrb[3].mxu1  ;;  %v177_v36 = vpop.f32.mrb[0].mxu0 }
 0x21c   :  { %v1616_v38 = vadd.f32 %v287_v34, %v231_v29  ;;  %v1235_v40 = vpop.f32.mrb[1].mxu0  ;;  %v178_v44 = vadd.f32 %v177_v36, %v127_v35 }
 0x21d   :  { %v1618_v41 = vpack.c.bf16 %v286_v33, %v282_v32  ;;  %v180_v42 = vpop.f32.mrb[2].mxu0 }
 0x21e   :  { %v292_v43 = vpack.c.bf16 %v1616_v38, %v1614_v37  ;;  %v181_v45 = vadd.f32 %v180_v42, %v127_v35  ;;  %v1236_v46 = vpop.f32.mrb[3].mxu0  ;;  %v1362_v37 = vld [vmem:[%s1804_s4 + $0x18] sm:$0xff]  }
 0x21f   :  { %419 = vrot.lane.b32.xlu0 %v1618_v41, %s1455_s18  ;;  %v298_v47 = vsel %vm293_vm3, %v1618_v41, 0 }
 0x220   :  { %v290_v48 = vpack.c.bf16 %v181_v45, %v178_v44  ;;  %1238 = vmatpush3.bf16.xpose.msra.mxu1 %v298_v47 }
 0x221   :  { %1249 = vmatprep.subr.bf16.mxu1 %v1452_v39 }
 0x222   :  { %417 = vrot.lane.b32.xlu1 %v290_v48, %s1455_s18 }
 0x223   :  { %669 = vrot.lane.b32.xlu0 %v1618_v41, %s1456_s19 }
 0x226   :  { %544 = vrot.lane.b32.xlu1 %v1618_v41, %s1457_s20 }
 0x227   :  { %1240 = vmatmul.mubr.msk.bf16.vlgmr.msra.gmra.mrb[4].mxu1 %vm293_vm3, %v290_v48 }
 0x228   :  { %1251 = vmatprep.mubr.msk.bf16.mxu1 %vm1454_vm2, %v1452_v39 }
 0x22a   :  { %542 = vrot.lane.b32.xlu1 %v290_v48, %s1457_s20 }
 0x22e   :  { %667 = vrot.lane.b32.xlu1 %v290_v48, %s1456_s19 }
 0x291   :  { %v420_v49 = vpop.permute.xlu0 %419 }
 0x292   :  { %v425_v50 = vsel %vm293_vm3, %v420_v49, 0 }
 0x293   :  { %1250 = vmatpush3.bf16.xpose.msra.mxu1 %v425_v50 }
 0x294   :  { %v418_v51 = vpop.permute.xlu1 %417  ;;  %1261 = vmatprep.subr.bf16.mxu1 %v1452_v39 }
 0x295   :  { %v670_v54 = vpop.permute.xlu0 %669 }
 0x296   :  { %v675_v56 = vsel %vm293_vm3, %v670_v54, 0 }
 0x298   :  { %v545_v52 = vpop.permute.xlu1 %544 }
 0x299   :  { %v550_v53 = vsel %vm293_vm3, %v545_v52, 0 }
 0x29a   :  { %1252 = vmatmul.mubr.msk.bf16.vlgmr.msra.gmra.mrb[8].mxu1 %vm293_vm3, %v418_v51 }
 0x29b   :  { %1262 = vmatpush3.bf16.xpose.msra.mxu1 %v550_v53  ;;  %1263 = vmatprep.mubr.msk.bf16.mxu1 %vm1454_vm2, %v1452_v39 }
 0x29c   :  { %1273 = vmatprep.subr.bf16.mxu1 %v1452_v39  ;;  %v543_v55 = vpop.permute.xlu1 %542 }
 0x2a0   :  { %v668_v57 = vpop.permute.xlu1 %667 }
 0x2a2   :  { %1264 = vmatmul.mubr.msk.bf16.vlgmr.msra.gmra.mrb[12].mxu1 %vm293_vm3, %v543_v55 }
 0x2a3   :  { %1274 = vmatpush3.bf16.xpose.msra.mxu1 %v675_v56  ;;  %1275 = vmatprep.mubr.msk.bf16.mxu1 %vm1454_vm2, %v1452_v39 }
 0x2a4   :  { %1285 = vmatprep.subr.bf16.mxu1 %v1452_v39 }
 0x2aa   :  { %1276 = vmatmul.mubr.msk.bf16.vlgmr.msra.gmra.mrb[16].mxu1 %vm293_vm3, %v668_v57 }
 0x2ab   :  { %1301 = vmatprep.mubr.msk.bf16.mxu1 %vm1454_vm2, %v1452_v39 }
 0x2fa   :  { %v334_v58 = vpop.f32.mrb[4].mxu1 }
 0x2fb   :  { %v341_v60 = vmul.f32 0.35355338, %v334_v58  ;;  %v1241_v61 = vpop.f32.mrb[5].mxu1 }
 0x2fc   :  { %v337_v62 = vpop.f32.mrb[6].mxu1 }
 0x2fd   :  { %v342_v8 = vmul.f32 0.35355338, %v337_v62  ;;  %v1242_v9 = vpop.f32.mrb[7].mxu1  ;;  %v343_v11 = vadd.f32 %v341_v60, %v86_v59 }
 0x2ff   :  { %v345_v12 = vsel %vm186_vm0, %v343_v11, -inf  ;;  %v344_v14 = vadd.f32 %v342_v8, %v87_v63 }
 0x300   :  { %346 = vmax.xlane.f32.xlu0 %v345_v12 }
 0x301   :  { %v348_v15 = vsel %vm186_vm0, %v344_v14, -inf }
 0x302   :  { %349 = vmax.xlane.f32.xlu1 %v348_v15 }
 0x36d   :  { %v461_v16 = vpop.f32.mrb[8].mxu1 }
 0x36e   :  { %v468_v17 = vmul.f32 0.35355338, %v461_v16  ;;  %v1253_v18 = vpop.f32.mrb[9].mxu1 }
 0x36f   :  { %v464_v19 = vpop.f32.mrb[10].mxu1 }
 0x370   :  { %v469_v20 = vmul.f32 0.35355338, %v464_v19  ;;  %v1254_v21 = vpop.f32.mrb[11].mxu1  ;;  %v470_v22 = vadd.f32 %v468_v17, %v86_v59 }
 0x372   :  { %v472_v23 = vsel %vm186_vm0, %v470_v22, -inf  ;;  %v471_v24 = vadd.f32 %v469_v20, %v87_v63 }
 0x373   :  { %473 = vmax.xlane.f32.xlu0 %v472_v23 }
 0x374   :  { %v475_v28 = vsel %vm186_vm0, %v471_v24, -inf }
 0x375   :  { %v586_v25 = vpop.f32.mrb[12].mxu1 }
 0x376   :  { %v593_v26 = vmul.f32 0.35355338, %v586_v25  ;;  %v1265_v27 = vpop.f32.mrb[13].mxu1 }
 0x377   :  { %476 = vmax.xlane.f32.xlu0 %v475_v28  ;;  %v589_v29 = vpop.f32.mrb[14].mxu1 }
 0x378   :  { %v594_v30 = vmul.f32 0.35355338, %v589_v29  ;;  %v1266_v31 = vpop.f32.mrb[15].mxu1  ;;  %v595_v32 = vadd.f32 %v593_v26, %v86_v59 }
 0x37a   :  { %v597_v33 = vsel %vm186_vm0, %v595_v32, -inf  ;;  %v596_v34 = vadd.f32 %v594_v30, %v87_v63 }
 0x37b   :  { %598 = vmax.xlane.f32.xlu0 %v597_v33 }
 0x37c   :  { %v600_v35 = vsel %vm186_vm0, %v596_v34, -inf }
 0x37d   :  { %601 = vmax.xlane.f32.xlu1 %v600_v35  ;;  %v711_v36 = vpop.f32.mrb[16].mxu1 }
 0x37e   :  { %v718_v40 = vmul.f32 0.35355338, %v711_v36  ;;  %v1277_v42 = vpop.f32.mrb[17].mxu1 }
 0x37f   :  { %v714_v44 = vpop.f32.mrb[18].mxu1 }
 0x380   :  { %v719_v45 = vmul.f32 0.35355338, %v714_v44  ;;  %v1278_v46 = vpop.f32.mrb[19].mxu1  ;;  %v720_v47 = vadd.f32 %v718_v40, %v86_v59 }
 0x382   :  { %v722_v48 = vsel %vm186_vm0, %v720_v47, -inf  ;;  %v721_v49 = vadd.f32 %v719_v45, %v87_v63 }
 0x383   :  { %723 = vmax.xlane.f32.xlu0 %v722_v48 }
 0x384   :  { %v725_v50 = vsel %vm186_vm0, %v721_v49, -inf }
 0x385   :  { %726 = vmax.xlane.f32.xlu1 %v725_v50 }
 0x38d   :  { %v347_v51 = vpop.xlane.xlu0 %346 }
 0x38e   :  { %v351_v52 = vsub.f32 %v343_v11, %v347_v51 }
 0x38f   :  { %v350_v53 = vpop.xlane.xlu1 %349 }
 0x390   :  { %v353_v54 = vmul.f32 1.442695, %v351_v52  ;;  %v352_v55 = vsub.f32 %v344_v14, %v350_v53 }
 0x392   :  { %1377 = vpow2.f32 %v353_v54  ;;  %v355_v56 = vmul.f32 1.442695, %v352_v55 }
 0x394   :  { %1379 = vpow2.f32 %v355_v56 }
 0x39c   :  { %v1660_v57 = vpop.eup %1377 }
 0x39d   :  { %v357_v58 = vsel %vm186_vm0, %v1660_v57, 0.0 }
 0x39e   :  { %v1664_v59 = vpop.eup %1379  ;;  %358 = vadd.xlane.f32.xlu0 %v357_v58 }
 0x39f   :  { %v360_v60 = vsel %vm186_vm0, %v1664_v59, 0.0 }
 0x3a0   :  { %361 = vadd.xlane.f32.xlu1 %v360_v60 }
 0x400   :  { %v474_v61 = vpop.xlane.xlu0 %473 }
 0x401   :  { %v478_v62 = vsub.f32 %v470_v22, %v474_v61 }
 0x403   :  { %v480_v63 = vmul.f32 1.442695, %v478_v62 }
 0x404   :  { %v477_v8 = vpop.xlane.xlu0 %476 }
 0x405   :  { %1381 = vpow2.f32 %v480_v63  ;;  %v479_v9 = vsub.f32 %v471_v24, %v477_v8 }
 0x407   :  { %v482_v11 = vmul.f32 1.442695, %v479_v9 }
 0x408   :  { %v599_v12 = vpop.xlane.xlu0 %598 }
 0x409   :  { %1383 = vpow2.f32 %v482_v11  ;;  %v603_v14 = vsub.f32 %v595_v32, %v599_v12 }
 0x40a   :  { %v602_v15 = vpop.xlane.xlu1 %601 }
 0x40b   :  { %v605_v16 = vmul.f32 1.442695, %v603_v14  ;;  %v604_v17 = vsub.f32 %v596_v34, %v602_v15 }
 0x40d   :  { %1385 = vpow2.f32 %v605_v16  ;;  %v607_v18 = vmul.f32 1.442695, %v604_v17 }
 0x40f   :  { %v1382_v19 = vpop.eup %1381  ;;  %1387 = vpow2.f32 %v607_v18 }
 0x410   :  { %v724_v20 = vpop.xlane.xlu0 %723  ;;  %v484_v21 = vsel %vm186_vm0, %v1382_v19, 0.0 }
 0x411   :  { %v728_v23 = vsub.f32 %v720_v47, %v724_v20  ;;  %485 = vadd.xlane.f32.xlu0 %v484_v21  ;;  %v1361_v21 = vld [vmem:[%s1804_s4 + $0x10] sm:$0xff]  }
 0x412   :  { %v727_v32 = vpop.xlane.xlu1 %726  ;;  %1286 = vmatpush3.bf16.msra.mxu1 %v1361_v21 }
 0x413   :  { %v1384_v22 = vpop.eup %1383  ;;  %v730_v25 = vmul.f32 1.442695, %v728_v23  ;;  %v729_v33 = vsub.f32 %v721_v49, %v727_v32  ;;  %1287 = vmatprep.subr.bf16.mxu1 %v1452_v39  ;;  %v1368_v32 = vld [vmem:[%s1804_s4 + $0x48] sm:$0xff]  }
 0x414   :  { %v487_v24 = vsel %vm186_vm0, %v1384_v22, 0.0 }
 0x415   :  { %1389 = vpow2.f32 %v730_v25  ;;  %488 = vadd.xlane.f32.xlu1 %v487_v24  ;;  %v732_v34 = vmul.f32 1.442695, %v729_v33 }
 0x416   :  { %1288 = vmatpush3.bf16.msra.mxu1 %v1362_v37 }
 0x417   :  { %v1386_v26 = vpop.eup %1385  ;;  %1391 = vpow2.f32 %v732_v34  ;;  %1289 = vmatprep.subr.bf16.mxu1 %v1452_v39 }
 0x418   :  { %v609_v27 = vsel %vm186_vm0, %v1386_v26, 0.0 }
 0x419   :  { %v1388_v28 = vpop.eup %1387  ;;  %610 = vadd.xlane.f32.xlu0 %v609_v27  ;;  %v1364_v27 = vld [vmem:[%s1804_s4 + $0x28] sm:$0xff]  }
 0x41a   :  { %v612_v29 = vsel %vm186_vm0, %v1388_v28, 0.0 }
 0x41b   :  { %613 = vadd.xlane.f32.xlu1 %v612_v29  ;;  %v1366_v29 = vld [vmem:[%s1804_s4 + $0x38] sm:$0xff]  }
 0x41f   :  { %v1672_v30 = vpop.eup %1389 }
 0x420   :  { %v734_v31 = vsel %vm186_vm0, %v1672_v30, 0.0 }
 0x421   :  { %735 = vadd.xlane.f32.xlu0 %v734_v31  ;;  %v1392_v35 = vpop.eup %1391 }
 0x422   :  { %v737_v36 = vsel %vm186_vm0, %v1392_v35, 0.0 }
 0x42b   :  { %v359_v42 = vpop.xlane.xlu0 %358 }
 0x42c   :  { %495 = vrot.lane.b32.xlu1 %v1618_v41, %s1458_s2 }
 0x42d   :  { %v362_v40 = vpop.xlane.xlu1 %361 }
 0x42e   :  { %1393 = vrcp.f32 %v362_v40 }
 0x42f   :  { %1395 = vrcp.f32 %v359_v42 }
 0x437   :  { %369 = vrot.lane.b32.xlu0 %v1618_v41, %s1459_s0 }
 0x438   :  { %v1394_v47 = vpop.eup %1393 }
 0x439   :  { %v1396_v49 = vpop.eup %1395  ;;  %v366_v50 = vmul.f32 %v1394_v47, %v1664_v59 }
 0x43a   :  { %v365_v52 = vmul.f32 %v1396_v49, %v1660_v57 }
 0x450   :  { %738 = vadd.xlane.f32.xlu1 %v737_v36 }
 0x461   :  { %620 = vrot.lane.b32.xlu1 %v1618_v41, %s1460_s1  ;;  %v367_v41 = vpack.c.bf16 %v366_v50, %v365_v52 }
 0x49e   :  { %v486_v44 = vpop.xlane.xlu0 %485 }
 0x4a2   :  { %v489_v45 = vpop.xlane.xlu1 %488 }
 0x4a3   :  { %1397 = vrcp.f32 %v489_v45 }
 0x4a4   :  { %1399 = vrcp.f32 %v486_v44 }
 0x4a6   :  { %v611_v46 = vpop.xlane.xlu0 %610 }
 0x4a8   :  { %v614_v51 = vpop.xlane.xlu1 %613 }
 0x4a9   :  { %1401 = vrcp.f32 %v614_v51 }
 0x4aa   :  { %1403 = vrcp.f32 %v611_v46 }
 0x4ac   :  { %v496_v55 = vpop.permute.xlu1 %495 }
 0x4ad   :  { %v1398_v54 = vpop.eup %1397 }
 0x4ae   :  { %v736_v48 = vpop.xlane.xlu0 %735  ;;  %v1400_v56 = vpop.eup %1399  ;;  %v493_v58 = vmul.f32 %v1398_v54, %v1384_v22 }
 0x4af   :  { %v492_v59 = vmul.f32 %v1400_v56, %v1382_v19  ;;  %1405 = vrcp.f32 %v736_v48 }
 0x4b1   :  { %v494_v60 = vpack.c.bf16 %v493_v58, %v492_v59 }
 0x4b2   :  { %v370_v53 = vpop.permute.xlu0 %369 }
 0x4b3   :  { %1244 = vmatpush3.bf16.msra.mxu0 %v370_v53  ;;  %v1402_v57 = vpop.eup %1401 }
 0x4b4   :  { %1255 = vmatprep.subr.bf16.mxu0 %v1452_v39  ;;  %v1404_v62 = vpop.eup %1403  ;;  %v618_v63 = vmul.f32 %v1402_v57, %v1388_v28  ;;  %v1365_v28 = vld [vmem:[%s1804_s4 + $0x30] sm:$0xff]  }
 0x4b5   :  { %v617_v8 = vmul.f32 %v1404_v62, %v1386_v26 }
 0x4b6   :  { %1246 = vmatmul.mubr.msk.bf16.vlgmr.msra.gmra.mrb[4].mxu0 %vm186_vm0, %v367_v41 }
 0x4b7   :  { %1256 = vmatpush3.bf16.msra.mxu0 %v496_v55  ;;  %1257 = vmatprep.mubr.msk.bf16.mxu0 %vm1454_vm2, %v1452_v39  ;;  %v619_v11 = vpack.c.bf16 %v618_v63, %v617_v8  ;;  %v929_v63 = vld [vmem:[%s1805_s5 + $0x6] ss:$0 sm:$0xff] }
 0x4b8   :  { %1267 = vmatprep.subr.bf16.mxu0 %v1452_v39 }
 0x4b9   :  { %v1406_v12 = vpop.eup %1405 }
 0x4ba   :  { %v742_v15 = vmul.f32 %v1406_v12, %v1672_v30  ;;  %v1367_v30 = vld [vmem:[%s1804_s4 + $0x40] sm:$0xff]  }
 0x4be   :  { %1258 = vmatmul.mubr.msk.bf16.vlgmr.msra.gmra.mrb[8].mxu0 %vm186_vm0, %v494_v60 }
 0x4bf   :  { %1269 = vmatprep.mubr.msk.bf16.mxu0 %vm1454_vm2, %v1452_v39 }
 0x4dd   :  { %v739_v61 = vpop.xlane.xlu1 %738 }
 0x4de   :  { %1407 = vrcp.f32 %v739_v61 }
 0x4e1   :  { %v621_v9 = vpop.permute.xlu1 %620 }
 0x4e2   :  { %1268 = vmatpush3.bf16.msra.mxu0 %v621_v9 }
 0x4e3   :  { %1279 = vmatprep.subr.bf16.mxu0 %v1452_v39 }
 0x4e5   :  { %1270 = vmatmul.mubr.msk.bf16.vlgmr.msra.gmra.mrb[12].mxu0 %vm186_vm0, %v619_v11 }
 0x4e6   :  { %1280 = vmatpush3.bf16.msra.mxu0 %v292_v43  ;;  %1281 = vmatprep.mubr.msk.bf16.mxu0 %vm1454_vm2, %v1452_v39  ;;  %v1363_v43 = vld [vmem:[%s1804_s4 + $0x20] sm:$0xff]  }
 0x4e7   :  { %1290 = vmatpush3.bf16.msra.mxu1 %v1363_v43 }
 0x4e8   :  { %v1408_v14 = vpop.eup %1407  ;;  %1291 = vmatprep.subr.bf16.mxu1 %v1452_v39 }
 0x4e9   :  { %v743_v16 = vmul.f32 %v1408_v14, %v1392_v35 }
 0x4eb   :  { %v744_v17 = vpack.c.bf16 %v743_v16, %v742_v15  ;;  %1292 = vmatpush3.bf16.msra.mxu1 %v1364_v27 }
 0x4ec   :  { %1293 = vmatprep.subr.bf16.mxu1 %v1452_v39 }
 0x4ed   :  { %1282 = vmatmul.mubr.msk.bf16.vlgmr.msra.gmra.mrb[16].mxu0 %vm186_vm0, %v744_v17 }
 0x4ef   :  { %1294 = vmatpush3.bf16.msra.mxu1 %v1365_v28 }
 0x4f0   :  { %1295 = vmatprep.subr.bf16.mxu1 %v1452_v39 }
 0x4f3   :  { %1296 = vmatpush3.bf16.msra.mxu1 %v1366_v29 }
 0x4f4   :  { %1297 = vmatprep.subr.bf16.mxu1 %v1452_v39 }
 0x4f7   :  { %1298 = vmatpush3.bf16.msra.mxu1 %v1367_v30 }
 0x4f8   :  { %1299 = vmatprep.subr.bf16.mxu1 %v1452_v39 }
 0x4fb   :  { %1300 = vmatpush3.bf16.msra.mxu1 %v1368_v32 }
 0x589   :  { %v409_v18 = vpop.f32.mrb[4].mxu0 }
 0x58a   :  { %v1247_v19 = vpop.f32.mrb[5].mxu0 }
 0x58b   :  { %v412_v20 = vpop.f32.mrb[6].mxu0 }
 0x58c   :  { %v1248_v23 = vpop.f32.mrb[7].mxu0 }
 0x591   :  { %v535_v38 = vpop.f32.mrb[8].mxu0 }
 0x592   :  { %v1259_v22 = vpop.f32.mrb[9].mxu0 }
 0x593   :  { %v538_v25 = vpop.f32.mrb[10].mxu0 }
 0x594   :  { %v1341_v24 = vpack.i.bf16 %v538_v25, %v535_v38  ;;  %v1260_v26 = vpop.f32.mrb[11].mxu0 }
 0x596   :  { %1342 = vrot.lane.b32.xlu1 %v1341_v24, %s1460_s1 }
 0x5b8   :  { %v660_v31 = vpop.f32.mrb[12].mxu0 }
 0x5b9   :  { %v1271_v33 = vpop.f32.mrb[13].mxu0 }
 0x5ba   :  { %v663_v34 = vpop.f32.mrb[14].mxu0 }
 0x5bb   :  { %v1346_v35 = vpack.i.bf16 %v663_v34, %v660_v31  ;;  %v1272_v36 = vpop.f32.mrb[15].mxu0 }
 0x5bd   :  { %1347 = vrot.lane.b32.xlu0 %v1346_v35, %s1458_s2 }
 0x5c0   :  { %v782_v40 = vpop.f32.mrb[16].mxu0 }
 0x5c1   :  { %v1283_v42 = vpop.f32.mrb[17].mxu0 }
 0x5c2   :  { %v785_v44 = vpop.f32.mrb[18].mxu0 }
 0x5c3   :  { %v1351_v45 = vpack.i.bf16 %v785_v44, %v782_v40  ;;  %v1284_v46 = vpop.f32.mrb[19].mxu0 }
 0x5c5   :  { %1352 = vrot.lane.b32.xlu1 %v1351_v45, %s1459_s0 }
 0x608   :  { %v1343_v47 = vpop.permute.xlu1 %1342 }
 0x609   :  { %v1345_v49 = vunpack.i.h.bf16 %v1343_v47  ;;  %v1344_v50 = vunpack.i.l.bf16 %v1343_v47 }
 0x60b   :  { %v814_v41 = vsel %vm90_vm1, %v412_v20, %v1345_v49  ;;  %v813_v54 = vsel %vm90_vm1, %v409_v18, %v1344_v50 }
 0x62f   :  { %v1348_v48 = vpop.permute.xlu0 %1347 }
 0x630   :  { %v1350_v51 = vunpack.i.h.bf16 %v1348_v48  ;;  %v1349_v52 = vunpack.i.l.bf16 %v1348_v48 }
 0x632   :  { %v817_v58 = vsel %vm815_vm4, %v814_v41, %v1350_v51  ;;  %v816_v59 = vsel %vm815_vm4, %v813_v54, %v1349_v52 }
 0x637   :  { %v1353_v53 = vpop.permute.xlu1 %1352 }
 0x638   :  { %v1355_v55 = vunpack.i.h.bf16 %v1353_v53  ;;  %v1354_v56 = vunpack.i.l.bf16 %v1353_v53 }
 0x63a   :  { %v820_v60 = vsel %vm818_vm5, %v817_v58, %v1355_v55  ;;  %v819_v57 = vsel %vm818_vm5, %v816_v59, %v1354_v56 }
 0x63b   :  { %v821_v61 = vpack.c.bf16 %v820_v60, %v819_v57 }
 0x63d   :  { %1302 = vmatmul.mubr.bf16.vlgmr.msra.gmra.mrb[20].mxu1 %v821_v61 }
 0x710   :  { %v920_v62 = vpop.f32.mrb[20].mxu1 }
 0x711   :  { %v927_v8 = vadd.f32 %v920_v62, %v1553_v10  ;;  %v1303_v9 = vpop.f32.mrb[21].mxu1 }
 0x712   :  { %v923_v11 = vpop.f32.mrb[22].mxu1 }
 0x713   :  { %v930_v12 = vadd.f32 %v929_v63, %v927_v8  ;;  %v928_v14 = vadd.f32 %v923_v11, %v1561_v13  ;;  %v1304_v15 = vpop.f32.mrb[23].mxu1 }
 0x715   :  { %v931_v16 = vadd.f32 %v929_v63, %v928_v14  ;;  %v938_v17 = vsel %vm90_vm1, %v930_v12, 0.0 }
 0x716   :  { %1448 = dma.done.wait [#allocation3], 1024 }
 0x717   :  { %1449 = vsyncadd [#allocation3], 4294966272  ;;  %1305 = vmatprep.subr.bf16.mxu0 %v1452_v39  ;;  %1309 = vmatprep.mubr.msk.bf16.mxu0 %vm1454_vm2, %v1452_v39  ;;  %v941_v10 = vsel %vm90_vm1, %v931_v16, 0.0  ;;  %v1409_v22 = vpack.i.bf16 %v931_v16, %v930_v12  ;;  %v936_v31 = vld [vmem:[%s1805_s5 + $0x7] ss:$0 sm:$0xff]  ;;  %vm1132_vm8 = vcmask 392192  }
 0x718   :  { %939 = vadd.xlane.f32.xlu0 %v938_v17  ;;  %1306 = vmatpush3.bf16.msra.mxu0 %v1507_v0  ;;  %v937_v35 = vld [vmem:[%s1805_s5 + $0x10] ss:$0 sm:$0xff] }
 0x719   :  { %1307 = vmatprep.subr.bf16.mxu0 %v1452_v39 }
 0x71c   :  { %942 = vadd.xlane.f32.xlu0 %v941_v10  ;;  %1308 = vmatpush3.bf16.msra.mxu0 %v1512_v1 }
 0x71d   :  { %1313 = vmatprep.subr.bf16.mxu0 %v1452_v39 }
 0x732   :  { %1410 = vrot.lane.b32.xlu0 %v1409_v22, %s1458_s2  ;;  %s1461_s2 = smov [#allocation4]  }
 0x733   :  { %s1140_s0 = sshll.u32 %s1461_s2, 4  ;;  %s1141_s0 = int_to_ptr.vmem [resolvable:$true] %s1140_s0 }
 0x734   :  { %s1426_s1 = scalar_lea.vmem %s1141_s0, 256  ;;  %p1431_p1 = scmp.lt.s32.totalorder %s1141_s0, %s1141_s0 }
 0x735   :  { %p1427_p0 = scmp.ne.s32.totalorder %s1141_s0, %s1426_s1  ;;  %p1432_p2 = scmp.lt.s32.totalorder %s1426_s1, %s1426_s1 }
 0x737   :  { %p1433_p3 = por %p1432_p2, %p1431_p1 }
 0x739   :  { %p1434_p4 = pnand %p1433_p3, %p1427_p0 }
 0x7a5   :  { %v940_v13 = vpop.xlane.xlu0 %939 }
 0x7a6   :  { %v944_v18 = vmul.f32 0.03125, %v940_v13 }
 0x7a8   :  { %v946_v19 = vsub.f32 %v930_v12, %v944_v18 }
 0x7a9   :  { %v943_v20 = vpop.xlane.xlu0 %942 }
 0x7aa   :  { %v945_v21 = vmul.f32 0.03125, %v943_v20  ;;  %v948_v23 = vmul.f32 %v946_v19, %v946_v19 }
 0x7ac   :  { %v947_v37 = vsub.f32 %v931_v16, %v945_v21  ;;  %v950_v38 = vsel %vm90_vm1, %v948_v23, 0.0 }
 0x7ad   :  { %951 = vadd.xlane.f32.xlu1 %v950_v38 }
 0x7ae   :  { %v949_v0 = vmul.f32 %v947_v37, %v947_v37 }
 0x7b0   :  { %v953_v43 = vsel %vm90_vm1, %v949_v0, 0.0 }
 0x7b1   :  { %954 = vadd.xlane.f32.xlu1 %v953_v43 }
 0x83a   :  { %v952_v1 = vpop.xlane.xlu1 %951 }
 0x83b   :  { %v956_v25 = vmul.f32 0.03125, %v952_v1 }
 0x83d   :  { %v958_v24 = vadd.f32 1e-05, %v956_v25 }
 0x83e   :  { %v955_v26 = vpop.xlane.xlu1 %954 }
 0x83f   :  { %1414 = vrsqrt.f32 %v958_v24  ;;  %v957_v27 = vmul.f32 0.03125, %v955_v26  ;;  %v1411_v24 = vpop.permute.xlu0 %1410 }
 0x841   :  { %v959_v28 = vadd.f32 1e-05, %v957_v27 }
 0x843   :  { %1416 = vrsqrt.f32 %v959_v28 }
 0x849   :  { %v1415_v29 = vpop.eup %1414 }
 0x84a   :  { %v962_v30 = vmul.f32 %v1415_v29, %v946_v19  ;;  %v1413_v29 = vunpack.i.h.bf16 %v1411_v24 }
 0x84c   :  { %v964_v34 = vmul.f32 %v962_v30, %v936_v31 }
 0x84d   :  { %v1417_v32 = vpop.eup %1416 }
 0x84e   :  { %v963_v33 = vmul.f32 %v1417_v32, %v947_v37  ;;  %v966_v40 = vadd.f32 %v964_v34, %v937_v35  ;;  %v1412_v32 = vunpack.i.l.bf16 %v1411_v24 }
 0x850   :  { %v965_v36 = vmul.f32 %v963_v33, %v936_v31 }
 0x852   :  { %v967_v42 = vadd.f32 %v965_v36, %v937_v35 }
 0x854   :  { %v968_v44 = vpack.c.bf16 %v967_v42, %v966_v40 }
 0x856   :  { %1310 = vmatmul.mubr.msk.bf16.vlgmr.msra.gmra.mrb[20].mxu0 %vm90_vm1, %v968_v44  ;;  %v1087_v44 = vld [vmem:[%s1805_s5 + $0x12] ss:$0 sm:$0xff] }
 0x857   :  { %1314 = vmatpush3.bf16.msra.mxu0 %v1517_v2  ;;  %1325 = vmatprep.mubr.msk.bf16.mxu0 %vm1454_vm2, %v1452_v39  ;;  %v971_v2 = vld [vmem:[%s1805_s5 + $0x11] ss:$0 sm:$0xff] }
 0x858   :  { %1315 = vmatprep.subr.bf16.mxu0 %v1452_v39 }
 0x85b   :  { %1316 = vmatpush3.bf16.msra.mxu0 %v1522_v3 }
 0x85c   :  { %1317 = vmatprep.subr.bf16.mxu0 %v1452_v39 }
 0x85f   :  { %1318 = vmatpush3.bf16.msra.mxu0 %v1527_v4 }
 0x860   :  { %1319 = vmatprep.subr.bf16.mxu0 %v1452_v39 }
 0x863   :  { %1320 = vmatpush3.bf16.msra.mxu0 %v1532_v5 }
 0x864   :  { %1321 = vmatprep.subr.bf16.mxu0 %v1452_v39 }
 0x867   :  { %1322 = vmatpush3.bf16.msra.mxu0 %v1537_v6 }
 0x868   :  { %1323 = vmatprep.subr.bf16.mxu0 %v1452_v39 }
 0x86b   :  { %1324 = vmatpush3.bf16.msra.mxu0 %v1542_v7 }
 0x929   :  { %v1009_v3 = vpop.f32.mrb[20].mxu0 }
 0x92a   :  { %v1010_v45 = vadd.f32 %v1009_v3, %v971_v2  ;;  %v1311_v46 = vpop.f32.mrb[21].mxu0 }
 0x92b   :  { %v1012_v4 = vpop.f32.mrb[22].mxu0 }
 0x92c   :  { %v1018_v47 = vmul.f32 0.70710677, %v1010_v45  ;;  %v1013_v48 = vadd.f32 %v1012_v4, %v971_v2  ;;  %v1312_v49 = vpop.f32.mrb[23].mxu0  ;;  %v1016_v28 = vmul.f32 0.5, %v1010_v45 }
 0x92e   :  { %v1020_v5 = vand.u32 2147483647, %v1018_v47  ;;  %v1019_v50 = vmul.f32 0.70710677, %v1013_v48  ;;  %vm1060_vm6 = vcmp.ge.f32.partialorder %v1018_v47, 0.0  ;;  %v1017_v31 = vmul.f32 0.5, %v1013_v48 }
 0x930   :  { %v1022_v51 = vmul.f32 0.3275911, %v1020_v5  ;;  %v1021_v52 = vand.u32 2147483647, %v1019_v50  ;;  %v1048_v7 = vsub.f32 0.0, %v1020_v5  ;;  %vm1061_vm7 = vcmp.ge.f32.partialorder %v1019_v50, 0.0 }
 0x932   :  { %v1024_v6 = vadd.f32 1.0, %v1022_v51  ;;  %v1023_v53 = vmul.f32 0.3275911, %v1021_v52  ;;  %v1049_v41 = vsub.f32 0.0, %v1021_v52  ;;  %v1050_v55 = vmul.f32 %v1048_v7, %v1020_v5 }
 0x934   :  { %1418 = vrcp.f32 %v1024_v6  ;;  %v1025_v39 = vadd.f32 1.0, %v1023_v53  ;;  %v1051_v59 = vmul.f32 %v1049_v41, %v1021_v52  ;;  %v1052_v57 = vmul.f32 1.442695, %v1050_v55 }
 0x936   :  { %1420 = vrcp.f32 %v1025_v39  ;;  %v1054_v8 = vmul.f32 1.442695, %v1051_v59 }
 0x937   :  { %1422 = vpow2.f32 %v1052_v57 }
 0x938   :  { %1424 = vpow2.f32 %v1054_v8 }
 0x93e   :  { %v1419_v54 = vpop.eup %1418 }
 0x93f   :  { %v1030_v56 = vmul.f32 1.0614054, %v1419_v54 }
 0x940   :  { %v1421_v58 = vpop.eup %1420 }
 0x941   :  { %v1032_v60 = vadd.f32 -1.4531521, %v1030_v56  ;;  %v1031_v61 = vmul.f32 1.0614054, %v1421_v58  ;;  %v1423_v20 = vpop.eup %1422 }
 0x942   :  { %v1425_v38 = vpop.eup %1424 }
 0x943   :  { %v1034_v62 = vmul.f32 %v1419_v54, %v1032_v60  ;;  %v1033_v63 = vadd.f32 -1.4531521, %v1031_v61 }
 0x945   :  { %v1036_v9 = vadd.f32 1.4214138, %v1034_v62  ;;  %v1035_v11 = vmul.f32 %v1421_v58, %v1033_v63 }
 0x947   :  { %v1038_v12 = vmul.f32 %v1419_v54, %v1036_v9  ;;  %v1037_v14 = vadd.f32 1.4214138, %v1035_v11 }
 0x949   :  { %v1040_v15 = vadd.f32 -0.28449672, %v1038_v12  ;;  %v1039_v16 = vmul.f32 %v1421_v58, %v1037_v14 }
 0x94b   :  { %v1042_v17 = vmul.f32 %v1419_v54, %v1040_v15  ;;  %v1041_v10 = vadd.f32 -0.28449672, %v1039_v16 }
 0x94d   :  { %v1044_v13 = vadd.f32 0.2548296, %v1042_v17  ;;  %v1043_v18 = vmul.f32 %v1421_v58, %v1041_v10 }
 0x94f   :  { %v1046_v19 = vmul.f32 %v1419_v54, %v1044_v13  ;;  %v1045_v21 = vadd.f32 0.2548296, %v1043_v18 }
 0x951   :  { %v1056_v23 = vmul.f32 %v1423_v20, %v1046_v19  ;;  %v1047_v37 = vmul.f32 %v1421_v58, %v1045_v21 }
 0x953   :  { %v1058_v0 = vsub.f32 1.0, %v1056_v23  ;;  %v1057_v43 = vmul.f32 %v1425_v38, %v1047_v37 }
 0x955   :  { %v1062_v22 = vsub.f32 0.0, %v1058_v0  ;;  %v1059_v1 = vsub.f32 1.0, %v1057_v43 }
 0x957   :  { %v1064_v25 = vsel %vm1060_vm6, %v1058_v0, %v1062_v22  ;;  %v1063_v26 = vsub.f32 0.0, %v1059_v1 }
 0x958   :  { %v1066_v27 = vadd.f32 1.0, %v1064_v25 }
 0x959   :  { %v1065_v30 = vsel %vm1061_vm7, %v1059_v1, %v1063_v26 }
 0x95a   :  { %v1067_v33 = vadd.f32 1.0, %v1065_v30  ;;  %v1068_v34 = vmul.f32 %v1066_v27, %v1016_v28 }
 0x95c   :  { %v1069_v35 = vmul.f32 %v1067_v33, %v1017_v31  ;;  %v1078_v36 = vsel %vm815_vm4, %v1068_v34, %v1412_v32 }
 0x95e   :  { %v1079_v40 = vsel %vm815_vm4, %v1069_v35, %v1413_v29 }
 0x95f   :  { %v1080_v42 = vpack.c.bf16 %v1079_v40, %v1078_v36 }
 0x961   :  { %1326 = vmatmul.mubr.msk.bf16.vlgmr.msra.gmra.mrb[24].mxu0 %vm818_vm5, %v1080_v42 }
 0xa34   :  { %v1125_v2 = vpop.f32.mrb[24].mxu0 }
 0xa35   :  { %v1126_v3 = vadd.f32 %v1125_v2, %v1087_v44  ;;  %v1327_v45 = vpop.f32.mrb[25].mxu0 }
 0xa36   :  { %v1128_v46 = vpop.f32.mrb[26].mxu0 }
 0xa37   :  { %1133 = vst.msk [vmem:[#allocation4] sm:$0xff] %vm1132_vm8, %v1126_v3  ;;  %v1129_v4 = vadd.f32 %v1128_v46, %v1087_v44  ;;  %v1328_v47 = vpop.f32.mrb[27].mxu0 }
 0xa39   :  { %1134 = vst.msk [vmem:[#allocation4 + $0x8] sm:$0xff] %vm1132_vm8, %v1129_v4 }
 0xa3a   :  { %1437 = shalt.err (!%p1434_p4)
}
 0xa3b   :  { %s1438_s25 = scalar_lea.hbm %s1807_s7, 256 }
 0xa3c   :  { %p1439_p5 = scmp.ne.s32.totalorder %s1807_s7, %s1438_s25  ;;  %p1442_p6 = scmp.lt.u32.totalorder %s1438_s25, %s1807_s7 }
 0xa3e   :  { %p1444_p7 = pnand %p1442_p6, %p1439_p5 }
 0xa40   :  { %1447 = shalt.err (!%p1444_p7)
}
 0xa41   :  { %s1462_s3 = smov 128   ;;  %s1463_s30 = smov 8  }
 0xa42   :  { %1146 = dma.vmem_to_hbm [thread:$0]  %s1141_s0, 256, %s1807_s7, [#allocation5], %s1462_s3, %s1462_s3, %s1463_s30  }
 0xa43   :  { %1450 = dma.done.wait [#allocation5], 256  }
 0xa44   :  { %1451 = vsyncadd [#allocation5], 4294967040 }
 0xa45   :  { %1150 = vsyncpa [#allocation5], 1 }
 0xa46   :  { %1151 = vsyncmov [#allocation3] }
 0xa49   :  { %s1152_s10 = vpop.sfrf %1151 }
 0xa4a   :  { %p1190_p8 = scmp.ne.s32.totalorder %s1152_s10, 0 }
 0xa4c   :  { %1156 = shalt.err (%p1190_p8)  }

</bundles_post_ra>
